<compile_context>
chip_gen: v5e
topology: v5e:2x2
jax: 0.10.0
libtpu: 0.0.40
codegen_flags: <defaults>
</compile_context>

<pallas_src>
import functools

import numpy as np
import jax
import jax.numpy as jnp
from jax import lax
from jax.experimental import pallas as pl
from jax.experimental.pallas import tpu as pltpu

H = W = 32                       # input image spatial size
PATCH = 4                        # backbone patch-embed stride
FEAT_SZ = H // PATCH             # 8   (box_head.feat_sz)
FEAT_LEN = FEAT_SZ * FEAT_SZ     # 64  (feat_len_s)
C_BB = 64                        # backbone output channels
C = 32                           # bottleneck / transformer hidden dim
LZ = 16                          # template (z) token length
LK = LZ + FEAT_LEN               # 80 keys (template + search)
PPF = 3 * PATCH * PATCH          # 48 raw features per patch token
LANES = 128
NEG = -1e9

# ImageNet mean/std stored at fp16 precision exactly like the torch
# Preprocessor buffers; folded offline so (x/255 - mean)/std @ W + b
#   == x @ (scale*W) + (b - offset @ W).
_MEAN = np.array([np.float16(v) for v in (0.485, 0.456, 0.406)], np.float32)
_STD = np.array([np.float16(v) for v in (0.229, 0.224, 0.225)], np.float32)
_SCALE = 1.0 / (255.0 * _STD)
_OFFSET = _MEAN / _STD

# --- packed-slab row offsets -------------------------------------------------
# per-call data slab (f32)
X_XP, X_M, X_Z, X_TB, X_ROWS = 0, 64, 96, 112, 120
# weight slab (bf16); all row-block starts are multiples of 16 (bf16 tiling)
W_BB, W_BN, W_QKVO, W_BOX, W_MV, W_MU, W_ROWS = 0, 128, 256, 288, 320, 448, 480
# f32 parameter slab
P_POSX, P_BBB, P_BBN, P_BATTN, P_BBOX, P_XSYS, P_ZIND, P_ROWS = 0, 64, 65, 66, 67, 68, 70, 72

_VMEM = functools.partial(pl.BlockSpec, memory_space=pltpu.MemorySpace.VMEM)


def _mask_sample_constants():
    """samp[j] = sum_{a,b} U[a,j] * m[a,b] * V[b,j]  (3x3 zero-padded window sum
    of the {mean>0} map at the nearest-neighbour sample point (4*py, 4*px))."""
    U = np.zeros((H, LK), np.float32)
    V = np.zeros((LANES, LK), np.float32)   # contraction dim padded to 128 lanes
    for j in range(LZ, LK):
        t = j - LZ
        py, px = t // FEAT_SZ, t % FEAT_SZ
        for a in range(H):
            if abs(a - 4 * py) <= 1:
                U[a, j] = 1.0
        for b in range(H):
            if abs(b - 4 * px) <= 1:
                V[b, j] = 1.0
    return U, V


# ---------------------------------------------------------------------------
# Single fused kernel: MaskModel + Preprocessor + backbone + bottleneck +
# transformer (single-head attention with key_padding_mask) + corner box head
# + box_xyxy_to_cxcywh.
# ---------------------------------------------------------------------------
def stark_fused_kernel(x_ref, w_ref, p_ref, o_ref):
    f32, bf16 = jnp.float32, jnp.bfloat16

    # ---- Stage 1: MaskModel + mask downsample -> key-padding bias -----------
    m_rows = x_ref[X_M:X_M + H, :]                                   # (32,128); lanes>=32 zero
    g = jnp.dot(m_rows.astype(bf16), w_ref[W_MV:W_MV + LANES, 0:LK],
                preferred_element_type=f32)                          # (32, 80)
    u = w_ref[W_MU:W_MU + H, 0:LK].astype(f32)                       # (32, 80)
    samp = jnp.sum(g * u, axis=0, keepdims=True)                     # (1, 80) window sums
    samp = samp + p_ref[P_ZIND:P_ZIND + 1, 0:LK]                     # template lanes forced visible
    key_bias = x_ref[X_TB:X_TB + 1, 0:LK] + jnp.where(samp < 0.5, NEG, 0.0)  # (1, 80)

    # ---- Stage 2: Preprocessor(folded) + backbone patch-embed + bottleneck --
    xp = x_ref[X_XP:X_XP + FEAT_LEN, :]                              # (64,128) raw pixels
    h = jnp.dot(xp.astype(bf16), w_ref[W_BB:W_BB + LANES, :],
                preferred_element_type=f32) + p_ref[P_BBB:P_BBB + 1, :]
    h = jnp.maximum(h, 0.0)                                          # (64,128); lanes>=64 zero
    feat_x = jnp.dot(h.astype(bf16), w_ref[W_BN:W_BN + LANES, 0:C],
                     preferred_element_type=f32) + p_ref[P_BBN:P_BBN + 1, 0:C]  # (64, 32)

    # ---- Stage 3: transformer (single-head attention, key_padding_mask) -----
    feat_z = x_ref[X_Z:X_Z + LZ, 0:C]                                # (16, 32)
    pos_z = x_ref[X_Z:X_Z + LZ, C:2 * C]                             # (16, 32)
    pos_x = p_ref[P_POSX:P_POSX + FEAT_LEN, 0:C]                     # (64, 32)
    vin = jnp.concatenate([feat_z, feat_x], axis=0)                  # (80, 32)
    kin = vin + jnp.concatenate([pos_z, pos_x], axis=0)              # (80, 32); rows[16:] == q_in

    b_attn = p_ref[P_BATTN:P_BATTN + 1, :]                           # (1,128) = [bq|bk|bv|bo]
    qk = jnp.dot(kin.astype(bf16), w_ref[W_QKVO:W_QKVO + C, 0:2 * C],
                 preferred_element_type=f32)                         # (80, 64) fused Q|K proj
    q = qk[LZ:LK, 0:C] + b_attn[:, 0:C]                              # (64, 32)
    k = qk[:, C:2 * C] + b_attn[:, C:2 * C]                          # (80, 32)
    v = jnp.dot(vin.astype(bf16), w_ref[W_QKVO:W_QKVO + C, 2 * C:3 * C],
                preferred_element_type=f32) + b_attn[:, 2 * C:3 * C]  # (80, 32)

    s = lax.dot_general(q.astype(bf16), k.astype(bf16), (((1,), (1,)), ((), ())),
                        preferred_element_type=f32) * (C ** -0.5)    # (64, 80)
    s = s + key_bias
    s = s - jnp.max(s, axis=-1, keepdims=True)
    p = jnp.exp(s)
    p = p * pl.reciprocal(jnp.sum(p, axis=-1, keepdims=True), approx=True)
    attn = jnp.dot(p.astype(bf16), v.astype(bf16), preferred_element_type=f32)  # (64, 32)
    memory = jnp.dot(attn.astype(bf16), w_ref[W_QKVO:W_QKVO + C, 3 * C:4 * C],
                     preferred_element_type=f32) + b_attn[:, 3 * C:4 * C]        # (64, 32)

    # ---- Stage 4: corner soft-argmax box head + box_xyxy_to_cxcywh ----------
    s2 = jnp.dot(memory.astype(bf16), w_ref[W_BOX:W_BOX + C, 0:2],
                 preferred_element_type=f32) + p_ref[P_BBOX:P_BBOX + 1, 0:2]     # (64, 2)=[tl|br]
    s2 = s2 - jnp.max(s2, axis=0, keepdims=True)
    p2 = jnp.exp(s2)
    p2 = p2 / jnp.sum(p2, axis=0, keepdims=True)                     # exact divide (output accuracy)

    xs_row = p_ref[P_XSYS:P_XSYS + 1, 0:FEAT_LEN]                    # (1, 64)
    ys_row = p_ref[P_XSYS + 1:P_XSYS + 2, 0:FEAT_LEN]
    ex = jnp.dot(xs_row, p2, preferred_element_type=f32)             # (1, 2) = [x_tl, x_br]
    ey = jnp.dot(ys_row, p2, preferred_element_type=f32)             # (1, 2) = [y_tl, y_br]

    lane2 = lax.broadcasted_iota(jnp.int32, (1, 2), 1)
    sgn = jnp.where(lane2 == 0, -1.0, 1.0)
    cx = 0.5 * jnp.sum(ex, axis=1, keepdims=True)                    # (x_tl + x_br) / 2
    cy = 0.5 * jnp.sum(ey, axis=1, keepdims=True)
    ww = jnp.sum(ex * sgn, axis=1, keepdims=True)                    # x_br - x_tl
    hh = jnp.sum(ey * sgn, axis=1, keepdims=True)

    lane4 = lax.broadcasted_iota(jnp.int32, (1, 4), 1)
    o_ref[...] = jnp.where(lane4 == 0, cx,
                 jnp.where(lane4 == 1, cy,
                 jnp.where(lane4 == 2, ww, hh)))


# ---------------------------------------------------------------------------
# Parameters (deterministic, synthetic) pre-packed into the two constant slabs.
# ---------------------------------------------------------------------------
def init_params(key):
    ks = jax.random.split(key, 8)

    def nrm(i, shape, scale):
        return jax.random.normal(ks[i], shape, jnp.float32) * scale

    w_bb = nrm(0, (PPF, C_BB), 0.05)
    b_bb = nrm(1, (1, C_BB), 0.01)
    w_bn = nrm(2, (C_BB, C), 0.05)
    b_bn = nrm(3, (1, C), 0.01)
    pos_x = nrm(4, (FEAT_LEN, C), 0.02)
    w_attn = nrm(5, (C, 4 * C), 0.08)       # lane-packed [Wq|Wk|Wv|Wo]
    b_attn = nrm(6, (1, 4 * C), 0.01)       # lane-packed [bq|bk|bv|bo]
    w_box = nrm(7, (C, 2), 0.1)             # [w_tl | w_br]
    b_box = jnp.zeros((1, 2), jnp.float32)

    # Fold the Preprocessor (x/255 - mean)/std into the first matmul.
    scale_vec = jnp.asarray(np.repeat(_SCALE, PATCH * PATCH), jnp.float32)    # (48,)
    offset_vec = jnp.asarray(np.repeat(_OFFSET, PATCH * PATCH), jnp.float32)  # (48,)
    w_bb_f = w_bb * scale_vec[:, None]
    b_bb_f = b_bb - offset_vec[None, :] @ w_bb

    U, V = _mask_sample_constants()

    w_slab = jnp.zeros((W_ROWS, LANES), jnp.float32)
    w_slab = w_slab.at[W_BB:W_BB + PPF, 0:C_BB].set(w_bb_f)
    w_slab = w_slab.at[W_BN:W_BN + C_BB, 0:C].set(w_bn)
    w_slab = w_slab.at[W_QKVO:W_QKVO + C, :].set(w_attn)
    w_slab = w_slab.at[W_BOX:W_BOX + C, 0:2].set(w_box)
    w_slab = w_slab.at[W_MV:W_MV + LANES, 0:LK].set(jnp.asarray(V))
    w_slab = w_slab.at[W_MU:W_MU + H, 0:LK].set(jnp.asarray(U))
    w_slab = w_slab.astype(jnp.bfloat16)

    xs = (np.arange(FEAT_LEN) % FEAT_SZ + 0.5) / FEAT_SZ
    ys = (np.arange(FEAT_LEN) // FEAT_SZ + 0.5) / FEAT_SZ

    p_slab = jnp.zeros((P_ROWS, LANES), jnp.float32)
    p_slab = p_slab.at[P_POSX:P_POSX + FEAT_LEN, 0:C].set(pos_x)
    p_slab = p_slab.at[P_BBB, 0:C_BB].set(b_bb_f[0])
    p_slab = p_slab.at[P_BBN, 0:C].set(b_bn[0])
    p_slab = p_slab.at[P_BATTN, :].set(b_attn[0])
    p_slab = p_slab.at[P_BBOX, 0:2].set(b_box[0])
    p_slab = p_slab.at[P_XSYS, 0:FEAT_LEN].set(jnp.asarray(xs, jnp.float32))
    p_slab = p_slab.at[P_XSYS + 1, 0:FEAT_LEN].set(jnp.asarray(ys, jnp.float32))
    p_slab = p_slab.at[P_ZIND, 0:LZ].set(1.0)

    return dict(w_slab=w_slab, p_slab=p_slab)


# ---------------------------------------------------------------------------
# STARK.forward
# ---------------------------------------------------------------------------
def stark_forward(img, feat_z, mask_z, pos_z, params):
    # img: (1,3,H,W); feat_z: (LZ,1,C); mask_z: (1,LZ) bool; pos_z: (LZ,1,C)
    img3 = img[0].astype(jnp.float32)                                # (3, H, W)

    # {channel-mean > 0} binary map for MaskModel (tiny XLA op; window sums +
    # nearest-neighbour sampling happen in-kernel via baked U/V).
    m = (jnp.sum(img3, axis=0) > 0.0).astype(jnp.float32)            # (H, W)

    # TODO(synk): raw-pixel patchify (5-D reshape/transpose) stays as one tiny
    # XLA op on the 12 KB image (no robust in-kernel Mosaic lowering).
    xp = img3.reshape(3, FEAT_SZ, PATCH, FEAT_SZ, PATCH)
    xp = jnp.transpose(xp, (1, 3, 0, 2, 4)).reshape(FEAT_LEN, PPF)

    tmpl_bias = jnp.where(mask_z[0], NEG, 0.0).astype(jnp.float32)   # (LZ,) lane-dense bias

    x_slab = jnp.zeros((X_ROWS, LANES), jnp.float32)
    x_slab = x_slab.at[X_XP:X_XP + FEAT_LEN, 0:PPF].set(xp)
    x_slab = x_slab.at[X_M:X_M + H, 0:W].set(m)
    x_slab = x_slab.at[X_Z:X_Z + LZ, 0:C].set(feat_z[:, 0, :])
    x_slab = x_slab.at[X_Z:X_Z + LZ, C:2 * C].set(pos_z[:, 0, :])
    x_slab = x_slab.at[X_TB, 0:LZ].set(tmpl_bias)

    coord = pl.pallas_call(
        stark_fused_kernel,
        out_shape=jax.ShapeDtypeStruct((1, 4), jnp.float32),
        in_specs=[_VMEM(), _VMEM(), _VMEM()],
        out_specs=_VMEM(),
        cost_estimate=pl.CostEstimate(flops=4_600_000, transcendentals=5_400,
                                      bytes_accessed=230_000),
    )(x_slab, params['w_slab'], params['p_slab'])
    return coord                                                     # (1,4)=(cx,cy,w,h)


if __name__ == "__main__":
    key = jax.random.PRNGKey(0)
    k_img, k_fz, k_pz, k_par = jax.random.split(key, 4)

    # Signed pixel values so the channel-mean>0 mask is non-trivial.
    img = jax.random.uniform(k_img, (1, 3, H, W), jnp.float32, -128.0, 255.0)
    feat_z = jax.random.normal(k_fz, (LZ, 1, C), jnp.float32) * 0.1
    pos_z = jax.random.normal(k_pz, (LZ, 1, C), jnp.float32) * 0.02
    mask_z = jnp.zeros((1, LZ), jnp.bool_)
    params = init_params(k_par)

    fwd = jax.jit(stark_forward)
    out = fwd(img, feat_z, mask_z, pos_z, params)
    out = jax.block_until_ready(out)
    assert out.shape == (1, 4)
    print("KERNEL_OK")
</pallas_src>

<mosaic_0001>
module attributes {stable_mosaic.version = 11 : i64} {
  func.func @stark_fused_kernel(%arg0: memref<120x128xf32, #tpu.memory_space<vmem>>, %arg1: memref<480x128xbf16, #tpu.memory_space<vmem>>, %arg2: memref<72x128xf32, #tpu.memory_space<vmem>>, %arg3: memref<1x4xf32, #tpu.memory_space<vmem>>) attributes {dimension_semantics = [], scalar_prefetch = 0 : i64, scratch_operands = 0 : i64, tpu.core_type = #tpu.core_type<tc>} {
    %c64 = arith.constant 64 : index
    %c0 = arith.constant 0 : index
    %0 = vector.load %arg0[%c64, %c0] : memref<120x128xf32, #tpu.memory_space<vmem>>, vector<32x128xf32>
    %1 = arith.truncf %0 : vector<32x128xf32> to vector<32x128xbf16>
    %c320 = arith.constant 320 : index
    %c0_0 = arith.constant 0 : index
    %2 = vector.load %arg1[%c320, %c0_0] : memref<480x128xbf16, #tpu.memory_space<vmem>>, vector<128x80xbf16>
    %cst = arith.constant dense<0.000000e+00> : vector<32x80xf32>
    %3 = tpu.matmul %1, %2, %cst {dimension_numbers = #tpu.dot_dimension_numbers<[1], [0], [0], [1], [0, 0, 1, 1], [], []>} : vector<32x128xbf16>, vector<128x80xbf16>, vector<32x80xf32> -> vector<32x80xf32>
    %c448 = arith.constant 448 : index
    %c0_1 = arith.constant 0 : index
    %4 = vector.load %arg1[%c448, %c0_1] : memref<480x128xbf16, #tpu.memory_space<vmem>>, vector<32x80xbf16>
    %5 = arith.extf %4 : vector<32x80xbf16> to vector<32x80xf32>
    %6 = arith.mulf %3, %5 : vector<32x80xf32>
    %cst_2 = arith.constant dense<0.000000e+00> : vector<80xf32>
    %7 = vector.multi_reduction <add>, %6, %cst_2 [0] : vector<32x80xf32> to vector<80xf32>
    %8 = vector.shape_cast %7 : vector<80xf32> to vector<1x80xf32>
    %c70 = arith.constant 70 : index
    %c0_3 = arith.constant 0 : index
    %9 = vector.load %arg2[%c70, %c0_3] : memref<72x128xf32, #tpu.memory_space<vmem>>, vector<1x80xf32>
    %10 = arith.addf %8, %9 : vector<1x80xf32>
    %c112 = arith.constant 112 : index
    %c0_4 = arith.constant 0 : index
    %11 = vector.load %arg0[%c112, %c0_4] : memref<120x128xf32, #tpu.memory_space<vmem>>, vector<1x80xf32>
    %cst_5 = arith.constant 5.000000e-01 : f32
    %12 = vector.broadcast %cst_5 : f32 to vector<1x80xf32>
    %13 = arith.cmpf olt, %10, %12 : vector<1x80xf32>
    %cst_6 = arith.constant -1.000000e+09 : f32
    %cst_7 = arith.constant 0.000000e+00 : f32
    %14 = vector.broadcast %cst_6 : f32 to vector<1x80xf32>
    %15 = vector.broadcast %cst_7 : f32 to vector<1x80xf32>
    %16 = arith.select %13, %14, %15 : vector<1x80xi1>, vector<1x80xf32>
    %17 = arith.addf %11, %16 : vector<1x80xf32>
    %c0_8 = arith.constant 0 : index
    %c0_9 = arith.constant 0 : index
    %18 = vector.load %arg0[%c0_8, %c0_9] : memref<120x128xf32, #tpu.memory_space<vmem>>, vector<64x128xf32>
    %19 = arith.truncf %18 : vector<64x128xf32> to vector<64x128xbf16>
    %c0_10 = arith.constant 0 : index
    %c0_11 = arith.constant 0 : index
    %20 = vector.load %arg1[%c0_10, %c0_11] : memref<480x128xbf16, #tpu.memory_space<vmem>>, vector<128x128xbf16>
    %cst_12 = arith.constant dense<0.000000e+00> : vector<64x128xf32>
    %21 = tpu.matmul %19, %20, %cst_12 {dimension_numbers = #tpu.dot_dimension_numbers<[1], [0], [0], [1], [0, 0, 1, 1], [], []>} : vector<64x128xbf16>, vector<128x128xbf16>, vector<64x128xf32> -> vector<64x128xf32>
    %c64_13 = arith.constant 64 : index
    %c0_14 = arith.constant 0 : index
    %22 = vector.load %arg2[%c64_13, %c0_14] : memref<72x128xf32, #tpu.memory_space<vmem>>, vector<1x128xf32>
    %23 = vector.broadcast %22 : vector<1x128xf32> to vector<64x128xf32>
    %24 = arith.addf %21, %23 : vector<64x128xf32>
    %cst_15 = arith.constant 0.000000e+00 : f32
    %25 = vector.broadcast %cst_15 : f32 to vector<64x128xf32>
    %26 = arith.maximumf %24, %25 : vector<64x128xf32>
    %27 = arith.truncf %26 : vector<64x128xf32> to vector<64x128xbf16>
    %c128 = arith.constant 128 : index
    %c0_16 = arith.constant 0 : index
    %28 = vector.load %arg1[%c128, %c0_16] : memref<480x128xbf16, #tpu.memory_space<vmem>>, vector<128x32xbf16>
    %cst_17 = arith.constant dense<0.000000e+00> : vector<64x32xf32>
    %29 = tpu.matmul %27, %28, %cst_17 {dimension_numbers = #tpu.dot_dimension_numbers<[1], [0], [0], [1], [0, 0, 1, 1], [], []>} : vector<64x128xbf16>, vector<128x32xbf16>, vector<64x32xf32> -> vector<64x32xf32>
    %c65 = arith.constant 65 : index
    %c0_18 = arith.constant 0 : index
    %30 = vector.load %arg2[%c65, %c0_18] : memref<72x128xf32, #tpu.memory_space<vmem>>, vector<1x32xf32>
    %31 = vector.broadcast %30 : vector<1x32xf32> to vector<64x32xf32>
    %32 = arith.addf %29, %31 : vector<64x32xf32>
    %c96 = arith.constant 96 : index
    %c0_19 = arith.constant 0 : index
    %33 = vector.load %arg0[%c96, %c0_19] : memref<120x128xf32, #tpu.memory_space<vmem>>, vector<16x32xf32>
    %c96_20 = arith.constant 96 : index
    %c32 = arith.constant 32 : index
    %34 = vector.load %arg0[%c96_20, %c32] : memref<120x128xf32, #tpu.memory_space<vmem>>, vector<16x32xf32>
    %c0_21 = arith.constant 0 : index
    %c0_22 = arith.constant 0 : index
    %35 = vector.load %arg2[%c0_21, %c0_22] : memref<72x128xf32, #tpu.memory_space<vmem>>, vector<64x32xf32>
    %36 = tpu.concatenate %33, %32 in 0 : vector<16x32xf32>, vector<64x32xf32> -> vector<80x32xf32>
    %37 = tpu.concatenate %34, %35 in 0 : vector<16x32xf32>, vector<64x32xf32> -> vector<80x32xf32>
    %38 = arith.addf %36, %37 : vector<80x32xf32>
    %c66 = arith.constant 66 : index
    %c0_23 = arith.constant 0 : index
    %39 = vector.load %arg2[%c66, %c0_23] : memref<72x128xf32, #tpu.memory_space<vmem>>, vector<1x128xf32>
    %40 = arith.truncf %38 : vector<80x32xf32> to vector<80x32xbf16>
    %c256 = arith.constant 256 : index
    %c0_24 = arith.constant 0 : index
    %41 = vector.load %arg1[%c256, %c0_24] : memref<480x128xbf16, #tpu.memory_space<vmem>>, vector<32x64xbf16>
    %cst_25 = arith.constant dense<0.000000e+00> : vector<80x64xf32>
    %42 = tpu.matmul %40, %41, %cst_25 {dimension_numbers = #tpu.dot_dimension_numbers<[1], [0], [0], [1], [0, 0, 1, 1], [], []>} : vector<80x32xbf16>, vector<32x64xbf16>, vector<80x64xf32> -> vector<80x64xf32>
    %43 = vector.extract_strided_slice %42 {offsets = [16, 0], sizes = [64, 32], strides = [1, 1]} : vector<80x64xf32> to vector<64x32xf32>
    %44 = vector.extract_strided_slice %39 {offsets = [0, 0], sizes = [1, 32], strides = [1, 1]} : vector<1x128xf32> to vector<1x32xf32>
    %45 = vector.broadcast %44 : vector<1x32xf32> to vector<64x32xf32>
    %46 = arith.addf %43, %45 : vector<64x32xf32>
    %47 = vector.extract_strided_slice %42 {offsets = [0, 32], sizes = [80, 32], strides = [1, 1]} : vector<80x64xf32> to vector<80x32xf32>
    %48 = vector.extract_strided_slice %39 {offsets = [0, 32], sizes = [1, 32], strides = [1, 1]} : vector<1x128xf32> to vector<1x32xf32>
    %49 = vector.broadcast %48 : vector<1x32xf32> to vector<80x32xf32>
    %50 = arith.addf %47, %49 : vector<80x32xf32>
    %51 = arith.truncf %36 : vector<80x32xf32> to vector<80x32xbf16>
    %c256_26 = arith.constant 256 : index
    %c64_27 = arith.constant 64 : index
    %52 = vector.load %arg1[%c256_26, %c64_27] : memref<480x128xbf16, #tpu.memory_space<vmem>>, vector<32x32xbf16>
    %cst_28 = arith.constant dense<0.000000e+00> : vector<80x32xf32>
    %53 = tpu.matmul %51, %52, %cst_28 {dimension_numbers = #tpu.dot_dimension_numbers<[1], [0], [0], [1], [0, 0, 1, 1], [], []>} : vector<80x32xbf16>, vector<32x32xbf16>, vector<80x32xf32> -> vector<80x32xf32>
    %54 = vector.extract_strided_slice %39 {offsets = [0, 64], sizes = [1, 32], strides = [1, 1]} : vector<1x128xf32> to vector<1x32xf32>
    %55 = vector.broadcast %54 : vector<1x32xf32> to vector<80x32xf32>
    %56 = arith.addf %53, %55 : vector<80x32xf32>
    %57 = arith.truncf %46 : vector<64x32xf32> to vector<64x32xbf16>
    %58 = arith.truncf %50 : vector<80x32xf32> to vector<80x32xbf16>
    %cst_29 = arith.constant dense<0.000000e+00> : vector<64x80xf32>
    %59 = tpu.matmul %57, %58, %cst_29 {dimension_numbers = #tpu.dot_dimension_numbers<[1], [1], [0], [0], [0, 0, 1, 0], [], []>} : vector<64x32xbf16>, vector<80x32xbf16>, vector<64x80xf32> -> vector<64x80xf32>
    %cst_30 = arith.constant 0.176776692 : f32
    %60 = vector.broadcast %cst_30 : f32 to vector<64x80xf32>
    %61 = arith.mulf %59, %60 : vector<64x80xf32>
    %62 = vector.broadcast %17 : vector<1x80xf32> to vector<64x80xf32>
    %63 = arith.addf %61, %62 : vector<64x80xf32>
    %cst_31 = arith.constant dense<0xFF800000> : vector<64xf32>
    %64 = vector.multi_reduction <maximumf>, %63, %cst_31 [1] : vector<64x80xf32> to vector<64xf32>
    %65 = vector.shape_cast %64 : vector<64xf32> to vector<64x1xf32>
    %66 = vector.broadcast %65 : vector<64x1xf32> to vector<64x80xf32>
    %67 = arith.subf %63, %66 : vector<64x80xf32>
    %68 = math.exp %67 : vector<64x80xf32>
    %cst_32 = arith.constant dense<0.000000e+00> : vector<64xf32>
    %69 = vector.multi_reduction <add>, %68, %cst_32 [1] : vector<64x80xf32> to vector<64xf32>
    %70 = vector.shape_cast %69 : vector<64xf32> to vector<64x1xf32>
    %71 = tpu.reciprocal %70 {approx = true} : vector<64x1xf32> -> vector<64x1xf32>
    %72 = vector.broadcast %71 : vector<64x1xf32> to vector<64x80xf32>
    %73 = arith.mulf %68, %72 : vector<64x80xf32>
    %74 = arith.truncf %73 : vector<64x80xf32> to vector<64x80xbf16>
    %75 = arith.truncf %56 : vector<80x32xf32> to vector<80x32xbf16>
    %cst_33 = arith.constant dense<0.000000e+00> : vector<64x32xf32>
    %76 = tpu.matmul %74, %75, %cst_33 {dimension_numbers = #tpu.dot_dimension_numbers<[1], [0], [0], [1], [0, 0, 1, 1], [], []>} : vector<64x80xbf16>, vector<80x32xbf16>, vector<64x32xf32> -> vector<64x32xf32>
    %77 = arith.truncf %76 : vector<64x32xf32> to vector<64x32xbf16>
    %c256_34 = arith.constant 256 : index
    %c96_35 = arith.constant 96 : index
    %78 = vector.load %arg1[%c256_34, %c96_35] : memref<480x128xbf16, #tpu.memory_space<vmem>>, vector<32x32xbf16>
    %cst_36 = arith.constant dense<0.000000e+00> : vector<64x32xf32>
    %79 = tpu.matmul %77, %78, %cst_36 {dimension_numbers = #tpu.dot_dimension_numbers<[1], [0], [0], [1], [0, 0, 1, 1], [], []>} : vector<64x32xbf16>, vector<32x32xbf16>, vector<64x32xf32> -> vector<64x32xf32>
    %80 = vector.extract_strided_slice %39 {offsets = [0, 96], sizes = [1, 32], strides = [1, 1]} : vector<1x128xf32> to vector<1x32xf32>
    %81 = vector.broadcast %80 : vector<1x32xf32> to vector<64x32xf32>
    %82 = arith.addf %79, %81 : vector<64x32xf32>
    %83 = arith.truncf %82 : vector<64x32xf32> to vector<64x32xbf16>
    %c288 = arith.constant 288 : index
    %c0_37 = arith.constant 0 : index
    %84 = vector.load %arg1[%c288, %c0_37] : memref<480x128xbf16, #tpu.memory_space<vmem>>, vector<32x2xbf16>
    %cst_38 = arith.constant dense<0.000000e+00> : vector<64x2xf32>
    %85 = tpu.matmul %83, %84, %cst_38 {dimension_numbers = #tpu.dot_dimension_numbers<[1], [0], [0], [1], [0, 0, 1, 1], [], []>} : vector<64x32xbf16>, vector<32x2xbf16>, vector<64x2xf32> -> vector<64x2xf32>
    %c67 = arith.constant 67 : index
    %c0_39 = arith.constant 0 : index
    %86 = vector.load %arg2[%c67, %c0_39] : memref<72x128xf32, #tpu.memory_space<vmem>>, vector<1x2xf32>
    %87 = vector.broadcast %86 : vector<1x2xf32> to vector<64x2xf32>
    %88 = arith.addf %85, %87 : vector<64x2xf32>
    %cst_40 = arith.constant dense<0xFF800000> : vector<2xf32>
    %89 = vector.multi_reduction <maximumf>, %88, %cst_40 [0] : vector<64x2xf32> to vector<2xf32>
    %90 = vector.shape_cast %89 : vector<2xf32> to vector<1x2xf32>
    %91 = vector.broadcast %90 : vector<1x2xf32> to vector<64x2xf32>
    %92 = arith.subf %88, %91 : vector<64x2xf32>
    %93 = math.exp %92 : vector<64x2xf32>
    %cst_41 = arith.constant dense<0.000000e+00> : vector<2xf32>
    %94 = vector.multi_reduction <add>, %93, %cst_41 [0] : vector<64x2xf32> to vector<2xf32>
    %95 = vector.shape_cast %94 : vector<2xf32> to vector<1x2xf32>
    %96 = vector.broadcast %95 : vector<1x2xf32> to vector<64x2xf32>
    %97 = arith.divf %93, %96 : vector<64x2xf32>
    %c68 = arith.constant 68 : index
    %c0_42 = arith.constant 0 : index
    %98 = vector.load %arg2[%c68, %c0_42] : memref<72x128xf32, #tpu.memory_space<vmem>>, vector<1x64xf32>
    %c69 = arith.constant 69 : index
    %c0_43 = arith.constant 0 : index
    %99 = vector.load %arg2[%c69, %c0_43] : memref<72x128xf32, #tpu.memory_space<vmem>>, vector<1x64xf32>
    %cst_44 = arith.constant dense<0.000000e+00> : vector<1x2xf32>
    %100 = tpu.matmul %98, %97, %cst_44 {dimension_numbers = #tpu.dot_dimension_numbers<[1], [0], [0], [1], [0, 0, 1, 1], [], []>} : vector<1x64xf32>, vector<64x2xf32>, vector<1x2xf32> -> vector<1x2xf32>
    %cst_45 = arith.constant dense<0.000000e+00> : vector<1x2xf32>
    %101 = tpu.matmul %99, %97, %cst_45 {dimension_numbers = #tpu.dot_dimension_numbers<[1], [0], [0], [1], [0, 0, 1, 1], [], []>} : vector<1x64xf32>, vector<64x2xf32>, vector<1x2xf32> -> vector<1x2xf32>
    %102 = tpu.iota {dimensions = array<i32: 1>} : vector<1x2xi32>
    %c0_i32 = arith.constant 0 : i32
    %103 = vector.broadcast %c0_i32 : i32 to vector<1x2xi32>
    %104 = arith.cmpi eq, %102, %103 : vector<1x2xi32>
    %cst_46 = arith.constant -1.000000e+00 : f32
    %cst_47 = arith.constant 1.000000e+00 : f32
    %105 = vector.broadcast %cst_46 : f32 to vector<1x2xf32>
    %106 = vector.broadcast %cst_47 : f32 to vector<1x2xf32>
    %107 = arith.select %104, %105, %106 : vector<1x2xi1>, vector<1x2xf32>
    %cst_48 = arith.constant dense<0.000000e+00> : vector<1xf32>
    %108 = vector.multi_reduction <add>, %100, %cst_48 [1] : vector<1x2xf32> to vector<1xf32>
    %109 = vector.shape_cast %108 : vector<1xf32> to vector<1x1xf32>
    %cst_49 = arith.constant 5.000000e-01 : f32
    %110 = vector.broadcast %cst_49 : f32 to vector<1x1xf32>
    %111 = arith.mulf %110, %109 : vector<1x1xf32>
    %cst_50 = arith.constant dense<0.000000e+00> : vector<1xf32>
    %112 = vector.multi_reduction <add>, %101, %cst_50 [1] : vector<1x2xf32> to vector<1xf32>
    %113 = vector.shape_cast %112 : vector<1xf32> to vector<1x1xf32>
    %cst_51 = arith.constant 5.000000e-01 : f32
    %114 = vector.broadcast %cst_51 : f32 to vector<1x1xf32>
    %115 = arith.mulf %114, %113 : vector<1x1xf32>
    %116 = arith.mulf %100, %107 : vector<1x2xf32>
    %cst_52 = arith.constant dense<0.000000e+00> : vector<1xf32>
    %117 = vector.multi_reduction <add>, %116, %cst_52 [1] : vector<1x2xf32> to vector<1xf32>
    %118 = vector.shape_cast %117 : vector<1xf32> to vector<1x1xf32>
    %119 = arith.mulf %101, %107 : vector<1x2xf32>
    %cst_53 = arith.constant dense<0.000000e+00> : vector<1xf32>
    %120 = vector.multi_reduction <add>, %119, %cst_53 [1] : vector<1x2xf32> to vector<1xf32>
    %121 = vector.shape_cast %120 : vector<1xf32> to vector<1x1xf32>
    %122 = tpu.iota {dimensions = array<i32: 1>} : vector<1x4xi32>
    %c0_i32_54 = arith.constant 0 : i32
    %123 = vector.broadcast %c0_i32_54 : i32 to vector<1x4xi32>
    %124 = arith.cmpi eq, %122, %123 : vector<1x4xi32>
    %c1_i32 = arith.constant 1 : i32
    %125 = vector.broadcast %c1_i32 : i32 to vector<1x4xi32>
    %126 = arith.cmpi eq, %122, %125 : vector<1x4xi32>
    %c2_i32 = arith.constant 2 : i32
    %127 = vector.broadcast %c2_i32 : i32 to vector<1x4xi32>
    %128 = arith.cmpi eq, %122, %127 : vector<1x4xi32>
    %129 = vector.shape_cast %118 : vector<1x1xf32> to vector<1x1xf32>
    %130 = vector.broadcast %129 : vector<1x1xf32> to vector<1x4xf32>
    %131 = vector.shape_cast %121 : vector<1x1xf32> to vector<1x1xf32>
    %132 = vector.broadcast %131 : vector<1x1xf32> to vector<1x4xf32>
    %133 = arith.select %128, %130, %132 : vector<1x4xi1>, vector<1x4xf32>
    %134 = vector.shape_cast %115 : vector<1x1xf32> to vector<1x1xf32>
    %135 = vector.broadcast %134 : vector<1x1xf32> to vector<1x4xf32>
    %136 = arith.select %126, %135, %133 : vector<1x4xi1>, vector<1x4xf32>
    %137 = vector.shape_cast %111 : vector<1x1xf32> to vector<1x1xf32>
    %138 = vector.broadcast %137 : vector<1x1xf32> to vector<1x4xf32>
    %139 = arith.select %124, %138, %136 : vector<1x4xi1>, vector<1x4xf32>
    %c0_55 = arith.constant 0 : index
    %c0_56 = arith.constant 0 : index
    %140 = vector.load %arg3[%c0_55, %c0_56] : memref<1x4xf32, #tpu.memory_space<vmem>>, vector<1x4xf32>
    tpu.vector_store %arg3[%c0_55, %c0_56], %139 {strides = array<i32>} : memref<1x4xf32, #tpu.memory_space<vmem>>, vector<1x4xf32>,
    return
  }
}

</mosaic_0001>

<bundles_post_ra>
// kernel: squeeze.6
= control target key start
LH: loop header
LB: loop body
LE: loop exit
PB: predicated region body
PF: predicated region fallthrough
CT: control target
= control target key end

     0   :  { %2 = vsyncpa [#allocation1], 0  ;;  %s1069_s8 = smov [#allocation0]   ;;  %s2038_s0 = inlined_call_operand.hbm [shape: f32[1,3,32,32], index: 0, kind: input, shape index: {}]   ;;  %s2039_s1 = inlined_call_operand.vmem [shape: f32[3,8,4,8,4], index: 1, kind: output, shape index: {}]  }
   0x1   :  { %s6_s0 = sshll.u32 %s2038_s0, 4  ;;  %s8_s9 = sshll.u32 %s1069_s8, 4  ;;  %s7_s0 = int_to_ptr.hbm [resolvable:$true] %s6_s0  ;;  %s9_s9 = int_to_ptr.vmem [resolvable:$true] %s8_s9 }
   0x2   :  { %11 = dma.hbm_to_vmem [thread:$0]  %s7_s0, 1536, %s9_s9, [#allocation1]  }
   0x3   :  { %1067 = dma.done.wait [#allocation1], 1536  }
   0x4   :  { %1068 = vsyncadd [#allocation1], 4294965760  ;;  %v1090_v0 = vld [vmem:[#allocation0 + $0x10] sm:$0xff]   ;;  %v1092_v1 = vld [vmem:[#allocation0] sm:$0xff]   ;;  %s1070_s10 = smov 124   ;;  %s1071_s11 = smov 120  }
   0x5   :  { %114 = vrot.lane.b32.xlu1 %v1090_v0, %s1070_s10  ;;  %96 = vrot.lane.b32.xlu0 %v1092_v1, %s1070_s10  ;;  %v1096_v2 = vld [vmem:[#allocation0 + $0x20] sm:$0xff]   ;;  %v1099_v3 = vld [vmem:[#allocation0 + $0x18] sm:$0xff]   ;;  %v1101_v4 = vld [vmem:[#allocation0 + $0x8] sm:$0xff]   ;;  %s1072_s12 = smov 116   ;;  %vm15_vm0 = vcmask 31744   ;;  %s1073_s13 = smov 112  }
   0x6   :  { %132 = vrot.lane.b32.xlu2 %v1096_v2, %s1070_s10  ;;  %v1103_v5 = vld [vmem:[#allocation0 + $0x28] sm:$0xff]   ;;  %v1108_v6 = vld [vmem:[#allocation0 + $0x38] sm:$0xff]   ;;  %v1110_v7 = vld [vmem:[#allocation0 + $0x30] sm:$0xff]   ;;  %16 = vst.msk [vmem:[%s2039_s1] ss:$8 sm:$0xf] %vm15_vm0, %v1092_v1  }
   0x7   :  { %v1112_v8 = vld [vmem:[#allocation0 + $0x40] sm:$0xff]   ;;  %v1117_v9 = vld [vmem:[#allocation0 + $0x50] sm:$0xff]   ;;  %v1119_v10 = vld [vmem:[#allocation0 + $0x48] sm:$0xff]   ;;  %17 = vst.msk [vmem:[%s2039_s1] ss:$8 sm:$0xf0] %vm15_vm0, %v1092_v1  }
   0x8   :  { %v1121_v11 = vld [vmem:[#allocation0 + $0x58] sm:$0xff]   ;;  %845 = vst.msk [vmem:[%s2039_s1 + $0x40] ss:$8 sm:$0xf] %vm15_vm0, %v1101_v4   ;;  %s1074_s7 = smov 108   ;;  %s1075_s26 = smov 104  }
   0x9   :  { %846 = vst.msk [vmem:[%s2039_s1 + $0x40] ss:$8 sm:$0xf0] %vm15_vm0, %v1101_v4   ;;  %s1076_s16 = smov 100  }
   0xa   :  { %847 = vst.msk [vmem:[%s2039_s1 + $0x80] ss:$8 sm:$0xf] %vm15_vm0, %v1090_v0  }
   0xb   :  { %848 = vst.msk [vmem:[%s2039_s1 + $0x80] ss:$8 sm:$0xf0] %vm15_vm0, %v1090_v0  }
   0xc   :  { %849 = vst.msk [vmem:[%s2039_s1 + $0xc0] ss:$8 sm:$0xf] %vm15_vm0, %v1099_v3  }
   0xd   :  { %123 = vrot.lane.b32.xlu1 %v1099_v3, %s1070_s10  ;;  %105 = vrot.lane.b32.xlu0 %v1101_v4, %s1070_s10  ;;  %850 = vst.msk [vmem:[%s2039_s1 + $0xc0] ss:$8 sm:$0xf0] %vm15_vm0, %v1099_v3  }
   0xe   :  { %141 = vrot.lane.b32.xlu2 %v1103_v5, %s1070_s10  ;;  %851 = vst.msk [vmem:[%s2039_s1 + $0x100] ss:$8 sm:$0xf] %vm15_vm0, %v1096_v2  }
   0xf   :  { %852 = vst.msk [vmem:[%s2039_s1 + $0x100] ss:$8 sm:$0xf0] %vm15_vm0, %v1096_v2  }
  0x10   :  { %853 = vst.msk [vmem:[%s2039_s1 + $0x140] ss:$8 sm:$0xf] %vm15_vm0, %v1103_v5  }
  0x11   :  { %854 = vst.msk [vmem:[%s2039_s1 + $0x140] ss:$8 sm:$0xf0] %vm15_vm0, %v1103_v5  }
  0x12   :  { %855 = vst.msk [vmem:[%s2039_s1 + $0x180] ss:$8 sm:$0xf] %vm15_vm0, %v1110_v7  }
  0x13   :  { %856 = vst.msk [vmem:[%s2039_s1 + $0x180] ss:$8 sm:$0xf0] %vm15_vm0, %v1110_v7  }
  0x14   :  { %857 = vst.msk [vmem:[%s2039_s1 + $0x1c0] ss:$8 sm:$0xf] %vm15_vm0, %v1108_v6  }
  0x15   :  { %159 = vrot.lane.b32.xlu1 %v1108_v6, %s1070_s10  ;;  %150 = vrot.lane.b32.xlu0 %v1110_v7, %s1070_s10  ;;  %858 = vst.msk [vmem:[%s2039_s1 + $0x1c0] ss:$8 sm:$0xf0] %vm15_vm0, %v1108_v6  }
  0x16   :  { %168 = vrot.lane.b32.xlu2 %v1112_v8, %s1070_s10  ;;  %859 = vst.msk [vmem:[%s2039_s1 + $0x200] ss:$8 sm:$0xf] %vm15_vm0, %v1112_v8  }
  0x17   :  { %860 = vst.msk [vmem:[%s2039_s1 + $0x200] ss:$8 sm:$0xf0] %vm15_vm0, %v1112_v8  }
  0x18   :  { %861 = vst.msk [vmem:[%s2039_s1 + $0x240] ss:$8 sm:$0xf] %vm15_vm0, %v1119_v10  }
  0x19   :  { %862 = vst.msk [vmem:[%s2039_s1 + $0x240] ss:$8 sm:$0xf0] %vm15_vm0, %v1119_v10  }
  0x1a   :  { %863 = vst.msk [vmem:[%s2039_s1 + $0x280] ss:$8 sm:$0xf] %vm15_vm0, %v1117_v9  }
  0x1b   :  { %864 = vst.msk [vmem:[%s2039_s1 + $0x280] ss:$8 sm:$0xf0] %vm15_vm0, %v1117_v9  }
  0x1c   :  { %865 = vst.msk [vmem:[%s2039_s1 + $0x2c0] ss:$8 sm:$0xf] %vm15_vm0, %v1121_v11  }
  0x1d   :  { %186 = vrot.lane.b32.xlu1 %v1117_v9, %s1070_s10  ;;  %177 = vrot.lane.b32.xlu0 %v1119_v10, %s1070_s10  ;;  %866 = vst.msk [vmem:[%s2039_s1 + $0x2c0] ss:$8 sm:$0xf0] %vm15_vm0, %v1121_v11  }
  0x1e   :  { %195 = vrot.lane.b32.xlu2 %v1121_v11, %s1070_s10 }
  0x25   :  { %212 = vrot.lane.b32.xlu1 %v1101_v4, %s1071_s11  ;;  %203 = vrot.lane.b32.xlu0 %v1092_v1, %s1071_s11 }
  0x26   :  { %221 = vrot.lane.b32.xlu2 %v1090_v0, %s1071_s11 }
  0x2d   :  { %239 = vrot.lane.b32.xlu1 %v1096_v2, %s1071_s11  ;;  %230 = vrot.lane.b32.xlu0 %v1099_v3, %s1071_s11 }
  0x2e   :  { %248 = vrot.lane.b32.xlu2 %v1103_v5, %s1071_s11 }
  0x35   :  { %266 = vrot.lane.b32.xlu1 %v1108_v6, %s1071_s11  ;;  %257 = vrot.lane.b32.xlu0 %v1110_v7, %s1071_s11 }
  0x36   :  { %275 = vrot.lane.b32.xlu2 %v1112_v8, %s1071_s11 }
  0x3d   :  { %293 = vrot.lane.b32.xlu1 %v1117_v9, %s1071_s11  ;;  %284 = vrot.lane.b32.xlu0 %v1119_v10, %s1071_s11 }
  0x3e   :  { %302 = vrot.lane.b32.xlu2 %v1121_v11, %s1071_s11 }
  0x45   :  { %319 = vrot.lane.b32.xlu1 %v1101_v4, %s1072_s12  ;;  %310 = vrot.lane.b32.xlu0 %v1092_v1, %s1072_s12 }
  0x46   :  { %328 = vrot.lane.b32.xlu2 %v1090_v0, %s1072_s12 }
  0x4d   :  { %346 = vrot.lane.b32.xlu1 %v1096_v2, %s1072_s12  ;;  %337 = vrot.lane.b32.xlu0 %v1099_v3, %s1072_s12 }
  0x4e   :  { %355 = vrot.lane.b32.xlu2 %v1103_v5, %s1072_s12 }
  0x55   :  { %373 = vrot.lane.b32.xlu1 %v1108_v6, %s1072_s12  ;;  %364 = vrot.lane.b32.xlu0 %v1110_v7, %s1072_s12 }
  0x56   :  { %382 = vrot.lane.b32.xlu2 %v1112_v8, %s1072_s12 }
  0x5d   :  { %400 = vrot.lane.b32.xlu1 %v1117_v9, %s1072_s12  ;;  %391 = vrot.lane.b32.xlu0 %v1119_v10, %s1072_s12 }
  0x5e   :  { %409 = vrot.lane.b32.xlu2 %v1121_v11, %s1072_s12 }
  0x60   :  { %v133_v12 = vpop.permute.xlu2 %132  }
  0x61   :  { %875 = vst.msk [vmem:[%s2039_s1 + $0x101] ss:$8 sm:$0xf] %vm15_vm0, %v133_v12  }
  0x62   :  { %876 = vst.msk [vmem:[%s2039_s1 + $0x101] ss:$8 sm:$0xf0] %vm15_vm0, %v133_v12  }
  0x65   :  { %426 = vrot.lane.b32.xlu1 %v1101_v4, %s1073_s13  ;;  %417 = vrot.lane.b32.xlu0 %v1092_v1, %s1073_s13 }
  0x66   :  { %435 = vrot.lane.b32.xlu2 %v1090_v0, %s1073_s13 }
  0x68   :  { %v142_v13 = vpop.permute.xlu2 %141  }
  0x69   :  { %877 = vst.msk [vmem:[%s2039_s1 + $0x141] ss:$8 sm:$0xf] %vm15_vm0, %v142_v13  }
  0x6a   :  { %878 = vst.msk [vmem:[%s2039_s1 + $0x141] ss:$8 sm:$0xf0] %vm15_vm0, %v142_v13  }
  0x6d   :  { %453 = vrot.lane.b32.xlu1 %v1096_v2, %s1073_s13  ;;  %444 = vrot.lane.b32.xlu0 %v1099_v3, %s1073_s13 }
  0x6e   :  { %462 = vrot.lane.b32.xlu2 %v1103_v5, %s1073_s13 }
  0x70   :  { %v169_v14 = vpop.permute.xlu2 %168  }
  0x71   :  { %883 = vst.msk [vmem:[%s2039_s1 + $0x201] ss:$8 sm:$0xf] %vm15_vm0, %v169_v14  }
  0x72   :  { %884 = vst.msk [vmem:[%s2039_s1 + $0x201] ss:$8 sm:$0xf0] %vm15_vm0, %v169_v14  }
  0x75   :  { %480 = vrot.lane.b32.xlu1 %v1108_v6, %s1073_s13  ;;  %471 = vrot.lane.b32.xlu0 %v1110_v7, %s1073_s13 }
  0x76   :  { %489 = vrot.lane.b32.xlu2 %v1112_v8, %s1073_s13 }
  0x77   :  { %v115_v15 = vpop.permute.xlu1 %114   ;;  %v97_v16 = vpop.permute.xlu0 %96  }
  0x78   :  { %871 = vst.msk [vmem:[%s2039_s1 + $0x81] ss:$8 sm:$0xf] %vm15_vm0, %v115_v15   ;;  %v196_v17 = vpop.permute.xlu2 %195  }
  0x79   :  { %872 = vst.msk [vmem:[%s2039_s1 + $0x81] ss:$8 sm:$0xf0] %vm15_vm0, %v115_v15  }
  0x7a   :  { %867 = vst.msk [vmem:[%s2039_s1 + $0x1] ss:$8 sm:$0xf] %vm15_vm0, %v97_v16  }
  0x7b   :  { %868 = vst.msk [vmem:[%s2039_s1 + $0x1] ss:$8 sm:$0xf0] %vm15_vm0, %v97_v16  }
  0x7c   :  { %889 = vst.msk [vmem:[%s2039_s1 + $0x2c1] ss:$8 sm:$0xf] %vm15_vm0, %v196_v17  }
  0x7d   :  { %507 = vrot.lane.b32.xlu1 %v1117_v9, %s1073_s13  ;;  %498 = vrot.lane.b32.xlu0 %v1119_v10, %s1073_s13  ;;  %890 = vst.msk [vmem:[%s2039_s1 + $0x2c1] ss:$8 sm:$0xf0] %vm15_vm0, %v196_v17  }
  0x7e   :  { %516 = vrot.lane.b32.xlu2 %v1121_v11, %s1073_s13 }
  0x7f   :  { %v124_v18 = vpop.permute.xlu1 %123   ;;  %v106_v19 = vpop.permute.xlu0 %105  }
  0x80   :  { %873 = vst.msk [vmem:[%s2039_s1 + $0xc1] ss:$8 sm:$0xf] %vm15_vm0, %v124_v18   ;;  %v222_v20 = vpop.permute.xlu2 %221  }
  0x81   :  { %874 = vst.msk [vmem:[%s2039_s1 + $0xc1] ss:$8 sm:$0xf0] %vm15_vm0, %v124_v18  }
  0x82   :  { %869 = vst.msk [vmem:[%s2039_s1 + $0x41] ss:$8 sm:$0xf] %vm15_vm0, %v106_v19  }
  0x83   :  { %870 = vst.msk [vmem:[%s2039_s1 + $0x41] ss:$8 sm:$0xf0] %vm15_vm0, %v106_v19  }
  0x84   :  { %895 = vst.msk [vmem:[%s2039_s1 + $0x82] ss:$8 sm:$0xf] %vm15_vm0, %v222_v20  }
  0x85   :  { %533 = vrot.lane.b32.xlu1 %v1101_v4, %s1074_s7  ;;  %524 = vrot.lane.b32.xlu0 %v1092_v1, %s1074_s7  ;;  %896 = vst.msk [vmem:[%s2039_s1 + $0x82] ss:$8 sm:$0xf0] %vm15_vm0, %v222_v20  }
  0x86   :  { %542 = vrot.lane.b32.xlu2 %v1090_v0, %s1074_s7 }
  0x87   :  { %v160_v21 = vpop.permute.xlu1 %159   ;;  %v151_v22 = vpop.permute.xlu0 %150  }
  0x88   :  { %881 = vst.msk [vmem:[%s2039_s1 + $0x1c1] ss:$8 sm:$0xf] %vm15_vm0, %v160_v21   ;;  %v249_v23 = vpop.permute.xlu2 %248  }
  0x89   :  { %882 = vst.msk [vmem:[%s2039_s1 + $0x1c1] ss:$8 sm:$0xf0] %vm15_vm0, %v160_v21  }
  0x8a   :  { %879 = vst.msk [vmem:[%s2039_s1 + $0x181] ss:$8 sm:$0xf] %vm15_vm0, %v151_v22  }
  0x8b   :  { %880 = vst.msk [vmem:[%s2039_s1 + $0x181] ss:$8 sm:$0xf0] %vm15_vm0, %v151_v22  }
  0x8c   :  { %901 = vst.msk [vmem:[%s2039_s1 + $0x142] ss:$8 sm:$0xf] %vm15_vm0, %v249_v23  }
  0x8d   :  { %560 = vrot.lane.b32.xlu1 %v1096_v2, %s1074_s7  ;;  %551 = vrot.lane.b32.xlu0 %v1099_v3, %s1074_s7  ;;  %902 = vst.msk [vmem:[%s2039_s1 + $0x142] ss:$8 sm:$0xf0] %vm15_vm0, %v249_v23  }
  0x8e   :  { %569 = vrot.lane.b32.xlu2 %v1103_v5, %s1074_s7 }
  0x8f   :  { %v187_v24 = vpop.permute.xlu1 %186   ;;  %v178_v25 = vpop.permute.xlu0 %177  }
  0x90   :  { %887 = vst.msk [vmem:[%s2039_s1 + $0x281] ss:$8 sm:$0xf] %vm15_vm0, %v187_v24   ;;  %v276_v26 = vpop.permute.xlu2 %275  }
  0x91   :  { %888 = vst.msk [vmem:[%s2039_s1 + $0x281] ss:$8 sm:$0xf0] %vm15_vm0, %v187_v24  }
  0x92   :  { %885 = vst.msk [vmem:[%s2039_s1 + $0x241] ss:$8 sm:$0xf] %vm15_vm0, %v178_v25  }
  0x93   :  { %886 = vst.msk [vmem:[%s2039_s1 + $0x241] ss:$8 sm:$0xf0] %vm15_vm0, %v178_v25  }
  0x94   :  { %907 = vst.msk [vmem:[%s2039_s1 + $0x202] ss:$8 sm:$0xf] %vm15_vm0, %v276_v26  }
  0x95   :  { %587 = vrot.lane.b32.xlu1 %v1108_v6, %s1074_s7  ;;  %578 = vrot.lane.b32.xlu0 %v1110_v7, %s1074_s7  ;;  %908 = vst.msk [vmem:[%s2039_s1 + $0x202] ss:$8 sm:$0xf0] %vm15_vm0, %v276_v26  }
  0x96   :  { %596 = vrot.lane.b32.xlu2 %v1112_v8, %s1074_s7 }
  0x97   :  { %v213_v27 = vpop.permute.xlu1 %212   ;;  %v204_v28 = vpop.permute.xlu0 %203  }
  0x98   :  { %893 = vst.msk [vmem:[%s2039_s1 + $0x42] ss:$8 sm:$0xf] %vm15_vm0, %v213_v27   ;;  %v303_v29 = vpop.permute.xlu2 %302  }
  0x99   :  { %894 = vst.msk [vmem:[%s2039_s1 + $0x42] ss:$8 sm:$0xf0] %vm15_vm0, %v213_v27  }
  0x9a   :  { %891 = vst.msk [vmem:[%s2039_s1 + $0x2] ss:$8 sm:$0xf] %vm15_vm0, %v204_v28  }
  0x9b   :  { %892 = vst.msk [vmem:[%s2039_s1 + $0x2] ss:$8 sm:$0xf0] %vm15_vm0, %v204_v28  }
  0x9c   :  { %913 = vst.msk [vmem:[%s2039_s1 + $0x2c2] ss:$8 sm:$0xf] %vm15_vm0, %v303_v29  }
  0x9d   :  { %614 = vrot.lane.b32.xlu1 %v1117_v9, %s1074_s7  ;;  %605 = vrot.lane.b32.xlu0 %v1119_v10, %s1074_s7  ;;  %914 = vst.msk [vmem:[%s2039_s1 + $0x2c2] ss:$8 sm:$0xf0] %vm15_vm0, %v303_v29  }
  0x9e   :  { %623 = vrot.lane.b32.xlu2 %v1121_v11, %s1074_s7 }
  0x9f   :  { %v240_v30 = vpop.permute.xlu1 %239   ;;  %v231_v31 = vpop.permute.xlu0 %230  }
  0xa0   :  { %899 = vst.msk [vmem:[%s2039_s1 + $0x102] ss:$8 sm:$0xf] %vm15_vm0, %v240_v30   ;;  %v329_v32 = vpop.permute.xlu2 %328  }
  0xa1   :  { %900 = vst.msk [vmem:[%s2039_s1 + $0x102] ss:$8 sm:$0xf0] %vm15_vm0, %v240_v30  }
  0xa2   :  { %897 = vst.msk [vmem:[%s2039_s1 + $0xc2] ss:$8 sm:$0xf] %vm15_vm0, %v231_v31  }
  0xa3   :  { %898 = vst.msk [vmem:[%s2039_s1 + $0xc2] ss:$8 sm:$0xf0] %vm15_vm0, %v231_v31  }
  0xa4   :  { %919 = vst.msk [vmem:[%s2039_s1 + $0x83] ss:$8 sm:$0xf] %vm15_vm0, %v329_v32  }
  0xa5   :  { %640 = vrot.lane.b32.xlu1 %v1101_v4, %s1075_s26  ;;  %631 = vrot.lane.b32.xlu0 %v1092_v1, %s1075_s26  ;;  %920 = vst.msk [vmem:[%s2039_s1 + $0x83] ss:$8 sm:$0xf0] %vm15_vm0, %v329_v32  }
  0xa6   :  { %649 = vrot.lane.b32.xlu2 %v1090_v0, %s1075_s26 }
  0xa7   :  { %v267_v33 = vpop.permute.xlu1 %266   ;;  %v258_v34 = vpop.permute.xlu0 %257  }
  0xa8   :  { %905 = vst.msk [vmem:[%s2039_s1 + $0x1c2] ss:$8 sm:$0xf] %vm15_vm0, %v267_v33   ;;  %v356_v35 = vpop.permute.xlu2 %355  }
  0xa9   :  { %906 = vst.msk [vmem:[%s2039_s1 + $0x1c2] ss:$8 sm:$0xf0] %vm15_vm0, %v267_v33  }
  0xaa   :  { %903 = vst.msk [vmem:[%s2039_s1 + $0x182] ss:$8 sm:$0xf] %vm15_vm0, %v258_v34  }
  0xab   :  { %904 = vst.msk [vmem:[%s2039_s1 + $0x182] ss:$8 sm:$0xf0] %vm15_vm0, %v258_v34  }
  0xac   :  { %925 = vst.msk [vmem:[%s2039_s1 + $0x143] ss:$8 sm:$0xf] %vm15_vm0, %v356_v35  }
  0xad   :  { %667 = vrot.lane.b32.xlu1 %v1096_v2, %s1075_s26  ;;  %658 = vrot.lane.b32.xlu0 %v1099_v3, %s1075_s26  ;;  %926 = vst.msk [vmem:[%s2039_s1 + $0x143] ss:$8 sm:$0xf0] %vm15_vm0, %v356_v35  }
  0xae   :  { %676 = vrot.lane.b32.xlu2 %v1103_v5, %s1075_s26 }
  0xaf   :  { %v294_v36 = vpop.permute.xlu1 %293   ;;  %v285_v37 = vpop.permute.xlu0 %284  }
  0xb0   :  { %911 = vst.msk [vmem:[%s2039_s1 + $0x282] ss:$8 sm:$0xf] %vm15_vm0, %v294_v36   ;;  %v383_v38 = vpop.permute.xlu2 %382  }
  0xb1   :  { %912 = vst.msk [vmem:[%s2039_s1 + $0x282] ss:$8 sm:$0xf0] %vm15_vm0, %v294_v36  }
  0xb2   :  { %909 = vst.msk [vmem:[%s2039_s1 + $0x242] ss:$8 sm:$0xf] %vm15_vm0, %v285_v37  }
  0xb3   :  { %910 = vst.msk [vmem:[%s2039_s1 + $0x242] ss:$8 sm:$0xf0] %vm15_vm0, %v285_v37  }
  0xb4   :  { %931 = vst.msk [vmem:[%s2039_s1 + $0x203] ss:$8 sm:$0xf] %vm15_vm0, %v383_v38  }
  0xb5   :  { %694 = vrot.lane.b32.xlu1 %v1108_v6, %s1075_s26  ;;  %685 = vrot.lane.b32.xlu0 %v1110_v7, %s1075_s26  ;;  %932 = vst.msk [vmem:[%s2039_s1 + $0x203] ss:$8 sm:$0xf0] %vm15_vm0, %v383_v38  }
  0xb6   :  { %703 = vrot.lane.b32.xlu2 %v1112_v8, %s1075_s26 }
  0xb7   :  { %v320_v39 = vpop.permute.xlu1 %319   ;;  %v311_v40 = vpop.permute.xlu0 %310  }
  0xb8   :  { %917 = vst.msk [vmem:[%s2039_s1 + $0x43] ss:$8 sm:$0xf] %vm15_vm0, %v320_v39   ;;  %v410_v41 = vpop.permute.xlu2 %409  }
  0xb9   :  { %918 = vst.msk [vmem:[%s2039_s1 + $0x43] ss:$8 sm:$0xf0] %vm15_vm0, %v320_v39  }
  0xba   :  { %915 = vst.msk [vmem:[%s2039_s1 + $0x3] ss:$8 sm:$0xf] %vm15_vm0, %v311_v40  }
  0xbb   :  { %916 = vst.msk [vmem:[%s2039_s1 + $0x3] ss:$8 sm:$0xf0] %vm15_vm0, %v311_v40  }
  0xbc   :  { %937 = vst.msk [vmem:[%s2039_s1 + $0x2c3] ss:$8 sm:$0xf] %vm15_vm0, %v410_v41  }
  0xbd   :  { %721 = vrot.lane.b32.xlu1 %v1117_v9, %s1075_s26  ;;  %712 = vrot.lane.b32.xlu0 %v1119_v10, %s1075_s26  ;;  %938 = vst.msk [vmem:[%s2039_s1 + $0x2c3] ss:$8 sm:$0xf0] %vm15_vm0, %v410_v41  }
  0xbe   :  { %730 = vrot.lane.b32.xlu2 %v1121_v11, %s1075_s26 }
  0xbf   :  { %v347_v42 = vpop.permute.xlu1 %346   ;;  %v338_v43 = vpop.permute.xlu0 %337  }
  0xc0   :  { %923 = vst.msk [vmem:[%s2039_s1 + $0x103] ss:$8 sm:$0xf] %vm15_vm0, %v347_v42   ;;  %v436_v44 = vpop.permute.xlu2 %435  }
  0xc1   :  { %924 = vst.msk [vmem:[%s2039_s1 + $0x103] ss:$8 sm:$0xf0] %vm15_vm0, %v347_v42  }
  0xc2   :  { %921 = vst.msk [vmem:[%s2039_s1 + $0xc3] ss:$8 sm:$0xf] %vm15_vm0, %v338_v43  }
  0xc3   :  { %922 = vst.msk [vmem:[%s2039_s1 + $0xc3] ss:$8 sm:$0xf0] %vm15_vm0, %v338_v43  }
  0xc4   :  { %943 = vst.msk [vmem:[%s2039_s1 + $0x84] ss:$8 sm:$0xf] %vm15_vm0, %v436_v44  }
  0xc5   :  { %747 = vrot.lane.b32.xlu1 %v1101_v4, %s1076_s16  ;;  %738 = vrot.lane.b32.xlu0 %v1092_v1, %s1076_s16  ;;  %944 = vst.msk [vmem:[%s2039_s1 + $0x84] ss:$8 sm:$0xf0] %vm15_vm0, %v436_v44  }
  0xc6   :  { %756 = vrot.lane.b32.xlu2 %v1090_v0, %s1076_s16 }
  0xc7   :  { %v374_v45 = vpop.permute.xlu1 %373   ;;  %v365_v46 = vpop.permute.xlu0 %364  }
  0xc8   :  { %929 = vst.msk [vmem:[%s2039_s1 + $0x1c3] ss:$8 sm:$0xf] %vm15_vm0, %v374_v45   ;;  %v463_v47 = vpop.permute.xlu2 %462  }
  0xc9   :  { %930 = vst.msk [vmem:[%s2039_s1 + $0x1c3] ss:$8 sm:$0xf0] %vm15_vm0, %v374_v45  }
  0xca   :  { %927 = vst.msk [vmem:[%s2039_s1 + $0x183] ss:$8 sm:$0xf] %vm15_vm0, %v365_v46  }
  0xcb   :  { %928 = vst.msk [vmem:[%s2039_s1 + $0x183] ss:$8 sm:$0xf0] %vm15_vm0, %v365_v46  }
  0xcc   :  { %949 = vst.msk [vmem:[%s2039_s1 + $0x144] ss:$8 sm:$0xf] %vm15_vm0, %v463_v47  }
  0xcd   :  { %774 = vrot.lane.b32.xlu1 %v1096_v2, %s1076_s16  ;;  %765 = vrot.lane.b32.xlu0 %v1099_v3, %s1076_s16  ;;  %950 = vst.msk [vmem:[%s2039_s1 + $0x144] ss:$8 sm:$0xf0] %vm15_vm0, %v463_v47  }
  0xce   :  { %783 = vrot.lane.b32.xlu2 %v1103_v5, %s1076_s16 }
  0xcf   :  { %v401_v48 = vpop.permute.xlu1 %400   ;;  %v392_v49 = vpop.permute.xlu0 %391  }
  0xd0   :  { %935 = vst.msk [vmem:[%s2039_s1 + $0x283] ss:$8 sm:$0xf] %vm15_vm0, %v401_v48   ;;  %v490_v50 = vpop.permute.xlu2 %489  }
  0xd1   :  { %936 = vst.msk [vmem:[%s2039_s1 + $0x283] ss:$8 sm:$0xf0] %vm15_vm0, %v401_v48  }
  0xd2   :  { %933 = vst.msk [vmem:[%s2039_s1 + $0x243] ss:$8 sm:$0xf] %vm15_vm0, %v392_v49  }
  0xd3   :  { %934 = vst.msk [vmem:[%s2039_s1 + $0x243] ss:$8 sm:$0xf0] %vm15_vm0, %v392_v49  }
  0xd4   :  { %955 = vst.msk [vmem:[%s2039_s1 + $0x204] ss:$8 sm:$0xf] %vm15_vm0, %v490_v50  }
  0xd5   :  { %801 = vrot.lane.b32.xlu1 %v1108_v6, %s1076_s16  ;;  %792 = vrot.lane.b32.xlu0 %v1110_v7, %s1076_s16  ;;  %956 = vst.msk [vmem:[%s2039_s1 + $0x204] ss:$8 sm:$0xf0] %vm15_vm0, %v490_v50  }
  0xd6   :  { %810 = vrot.lane.b32.xlu2 %v1112_v8, %s1076_s16 }
  0xd7   :  { %v427_v51 = vpop.permute.xlu1 %426   ;;  %v418_v52 = vpop.permute.xlu0 %417  }
  0xd8   :  { %941 = vst.msk [vmem:[%s2039_s1 + $0x44] ss:$8 sm:$0xf] %vm15_vm0, %v427_v51   ;;  %v517_v53 = vpop.permute.xlu2 %516  }
  0xd9   :  { %942 = vst.msk [vmem:[%s2039_s1 + $0x44] ss:$8 sm:$0xf0] %vm15_vm0, %v427_v51  }
  0xda   :  { %939 = vst.msk [vmem:[%s2039_s1 + $0x4] ss:$8 sm:$0xf] %vm15_vm0, %v418_v52  }
  0xdb   :  { %940 = vst.msk [vmem:[%s2039_s1 + $0x4] ss:$8 sm:$0xf0] %vm15_vm0, %v418_v52  }
  0xdc   :  { %961 = vst.msk [vmem:[%s2039_s1 + $0x2c4] ss:$8 sm:$0xf] %vm15_vm0, %v517_v53  }
  0xdd   :  { %828 = vrot.lane.b32.xlu1 %v1117_v9, %s1076_s16  ;;  %819 = vrot.lane.b32.xlu0 %v1119_v10, %s1076_s16  ;;  %962 = vst.msk [vmem:[%s2039_s1 + $0x2c4] ss:$8 sm:$0xf0] %vm15_vm0, %v517_v53  }
  0xde   :  { %837 = vrot.lane.b32.xlu2 %v1121_v11, %s1076_s16 }
  0xdf   :  { %v454_v54 = vpop.permute.xlu1 %453   ;;  %v445_v55 = vpop.permute.xlu0 %444  }
  0xe0   :  { %947 = vst.msk [vmem:[%s2039_s1 + $0x104] ss:$8 sm:$0xf] %vm15_vm0, %v454_v54   ;;  %v543_v56 = vpop.permute.xlu2 %542  }
  0xe1   :  { %948 = vst.msk [vmem:[%s2039_s1 + $0x104] ss:$8 sm:$0xf0] %vm15_vm0, %v454_v54  }
  0xe2   :  { %945 = vst.msk [vmem:[%s2039_s1 + $0xc4] ss:$8 sm:$0xf] %vm15_vm0, %v445_v55  }
  0xe3   :  { %946 = vst.msk [vmem:[%s2039_s1 + $0xc4] ss:$8 sm:$0xf0] %vm15_vm0, %v445_v55  }
  0xe4   :  { %967 = vst.msk [vmem:[%s2039_s1 + $0x85] ss:$8 sm:$0xf] %vm15_vm0, %v543_v56  }
  0xe5   :  { %968 = vst.msk [vmem:[%s2039_s1 + $0x85] ss:$8 sm:$0xf0] %vm15_vm0, %v543_v56  }
  0xe7   :  { %v481_v57 = vpop.permute.xlu1 %480   ;;  %v472_v58 = vpop.permute.xlu0 %471  }
  0xe8   :  { %953 = vst.msk [vmem:[%s2039_s1 + $0x1c4] ss:$8 sm:$0xf] %vm15_vm0, %v481_v57   ;;  %v570_v59 = vpop.permute.xlu2 %569  }
  0xe9   :  { %954 = vst.msk [vmem:[%s2039_s1 + $0x1c4] ss:$8 sm:$0xf0] %vm15_vm0, %v481_v57  }
  0xea   :  { %951 = vst.msk [vmem:[%s2039_s1 + $0x184] ss:$8 sm:$0xf] %vm15_vm0, %v472_v58  }
  0xeb   :  { %952 = vst.msk [vmem:[%s2039_s1 + $0x184] ss:$8 sm:$0xf0] %vm15_vm0, %v472_v58  }
  0xec   :  { %973 = vst.msk [vmem:[%s2039_s1 + $0x145] ss:$8 sm:$0xf] %vm15_vm0, %v570_v59  }
  0xed   :  { %974 = vst.msk [vmem:[%s2039_s1 + $0x145] ss:$8 sm:$0xf0] %vm15_vm0, %v570_v59  }
  0xef   :  { %v508_v60 = vpop.permute.xlu1 %507   ;;  %v499_v61 = vpop.permute.xlu0 %498  }
  0xf0   :  { %959 = vst.msk [vmem:[%s2039_s1 + $0x284] ss:$8 sm:$0xf] %vm15_vm0, %v508_v60   ;;  %v597_v62 = vpop.permute.xlu2 %596  }
  0xf1   :  { %960 = vst.msk [vmem:[%s2039_s1 + $0x284] ss:$8 sm:$0xf0] %vm15_vm0, %v508_v60  }
  0xf2   :  { %957 = vst.msk [vmem:[%s2039_s1 + $0x244] ss:$8 sm:$0xf] %vm15_vm0, %v499_v61  }
  0xf3   :  { %958 = vst.msk [vmem:[%s2039_s1 + $0x244] ss:$8 sm:$0xf0] %vm15_vm0, %v499_v61  }
  0xf4   :  { %979 = vst.msk [vmem:[%s2039_s1 + $0x205] ss:$8 sm:$0xf] %vm15_vm0, %v597_v62  }
  0xf5   :  { %980 = vst.msk [vmem:[%s2039_s1 + $0x205] ss:$8 sm:$0xf0] %vm15_vm0, %v597_v62  }
  0xf7   :  { %v534_v63 = vpop.permute.xlu1 %533   ;;  %v525_v0 = vpop.permute.xlu0 %524  }
  0xf8   :  { %965 = vst.msk [vmem:[%s2039_s1 + $0x45] ss:$8 sm:$0xf] %vm15_vm0, %v534_v63   ;;  %v624_v1 = vpop.permute.xlu2 %623  }
  0xf9   :  { %966 = vst.msk [vmem:[%s2039_s1 + $0x45] ss:$8 sm:$0xf0] %vm15_vm0, %v534_v63  }
  0xfa   :  { %963 = vst.msk [vmem:[%s2039_s1 + $0x5] ss:$8 sm:$0xf] %vm15_vm0, %v525_v0  }
  0xfb   :  { %964 = vst.msk [vmem:[%s2039_s1 + $0x5] ss:$8 sm:$0xf0] %vm15_vm0, %v525_v0  }
  0xfc   :  { %985 = vst.msk [vmem:[%s2039_s1 + $0x2c5] ss:$8 sm:$0xf] %vm15_vm0, %v624_v1  }
  0xfd   :  { %986 = vst.msk [vmem:[%s2039_s1 + $0x2c5] ss:$8 sm:$0xf0] %vm15_vm0, %v624_v1  }
  0xff   :  { %v561_v2 = vpop.permute.xlu1 %560   ;;  %v552_v3 = vpop.permute.xlu0 %551  }
 0x100   :  { %971 = vst.msk [vmem:[%s2039_s1 + $0x105] ss:$8 sm:$0xf] %vm15_vm0, %v561_v2   ;;  %v650_v4 = vpop.permute.xlu2 %649  }
 0x101   :  { %972 = vst.msk [vmem:[%s2039_s1 + $0x105] ss:$8 sm:$0xf0] %vm15_vm0, %v561_v2  }
 0x102   :  { %969 = vst.msk [vmem:[%s2039_s1 + $0xc5] ss:$8 sm:$0xf] %vm15_vm0, %v552_v3  }
 0x103   :  { %970 = vst.msk [vmem:[%s2039_s1 + $0xc5] ss:$8 sm:$0xf0] %vm15_vm0, %v552_v3  }
 0x104   :  { %991 = vst.msk [vmem:[%s2039_s1 + $0x86] ss:$8 sm:$0xf] %vm15_vm0, %v650_v4  }
 0x105   :  { %992 = vst.msk [vmem:[%s2039_s1 + $0x86] ss:$8 sm:$0xf0] %vm15_vm0, %v650_v4  }
 0x107   :  { %v588_v5 = vpop.permute.xlu1 %587   ;;  %v579_v6 = vpop.permute.xlu0 %578  }
 0x108   :  { %977 = vst.msk [vmem:[%s2039_s1 + $0x1c5] ss:$8 sm:$0xf] %vm15_vm0, %v588_v5   ;;  %v677_v7 = vpop.permute.xlu2 %676  }
 0x109   :  { %978 = vst.msk [vmem:[%s2039_s1 + $0x1c5] ss:$8 sm:$0xf0] %vm15_vm0, %v588_v5  }
 0x10a   :  { %975 = vst.msk [vmem:[%s2039_s1 + $0x185] ss:$8 sm:$0xf] %vm15_vm0, %v579_v6  }
 0x10b   :  { %976 = vst.msk [vmem:[%s2039_s1 + $0x185] ss:$8 sm:$0xf0] %vm15_vm0, %v579_v6  }
 0x10c   :  { %997 = vst.msk [vmem:[%s2039_s1 + $0x146] ss:$8 sm:$0xf] %vm15_vm0, %v677_v7  }
 0x10d   :  { %998 = vst.msk [vmem:[%s2039_s1 + $0x146] ss:$8 sm:$0xf0] %vm15_vm0, %v677_v7  }
 0x10f   :  { %v615_v8 = vpop.permute.xlu1 %614   ;;  %v606_v9 = vpop.permute.xlu0 %605  }
 0x110   :  { %983 = vst.msk [vmem:[%s2039_s1 + $0x285] ss:$8 sm:$0xf] %vm15_vm0, %v615_v8   ;;  %v704_v10 = vpop.permute.xlu2 %703  }
 0x111   :  { %984 = vst.msk [vmem:[%s2039_s1 + $0x285] ss:$8 sm:$0xf0] %vm15_vm0, %v615_v8  }
 0x112   :  { %981 = vst.msk [vmem:[%s2039_s1 + $0x245] ss:$8 sm:$0xf] %vm15_vm0, %v606_v9  }
 0x113   :  { %982 = vst.msk [vmem:[%s2039_s1 + $0x245] ss:$8 sm:$0xf0] %vm15_vm0, %v606_v9  }
 0x114   :  { %1003 = vst.msk [vmem:[%s2039_s1 + $0x206] ss:$8 sm:$0xf] %vm15_vm0, %v704_v10  }
 0x115   :  { %1004 = vst.msk [vmem:[%s2039_s1 + $0x206] ss:$8 sm:$0xf0] %vm15_vm0, %v704_v10  }
 0x117   :  { %v641_v11 = vpop.permute.xlu1 %640   ;;  %v632_v12 = vpop.permute.xlu0 %631  }
 0x118   :  { %989 = vst.msk [vmem:[%s2039_s1 + $0x46] ss:$8 sm:$0xf] %vm15_vm0, %v641_v11   ;;  %v731_v13 = vpop.permute.xlu2 %730  }
 0x119   :  { %990 = vst.msk [vmem:[%s2039_s1 + $0x46] ss:$8 sm:$0xf0] %vm15_vm0, %v641_v11  }
 0x11a   :  { %987 = vst.msk [vmem:[%s2039_s1 + $0x6] ss:$8 sm:$0xf] %vm15_vm0, %v632_v12  }
 0x11b   :  { %988 = vst.msk [vmem:[%s2039_s1 + $0x6] ss:$8 sm:$0xf0] %vm15_vm0, %v632_v12  }
 0x11c   :  { %1009 = vst.msk [vmem:[%s2039_s1 + $0x2c6] ss:$8 sm:$0xf] %vm15_vm0, %v731_v13  }
 0x11d   :  { %1010 = vst.msk [vmem:[%s2039_s1 + $0x2c6] ss:$8 sm:$0xf0] %vm15_vm0, %v731_v13  }
 0x11f   :  { %v668_v14 = vpop.permute.xlu1 %667   ;;  %v659_v15 = vpop.permute.xlu0 %658  }
 0x120   :  { %995 = vst.msk [vmem:[%s2039_s1 + $0x106] ss:$8 sm:$0xf] %vm15_vm0, %v668_v14   ;;  %v757_v16 = vpop.permute.xlu2 %756  }
 0x121   :  { %996 = vst.msk [vmem:[%s2039_s1 + $0x106] ss:$8 sm:$0xf0] %vm15_vm0, %v668_v14  }
 0x122   :  { %993 = vst.msk [vmem:[%s2039_s1 + $0xc6] ss:$8 sm:$0xf] %vm15_vm0, %v659_v15  }
 0x123   :  { %994 = vst.msk [vmem:[%s2039_s1 + $0xc6] ss:$8 sm:$0xf0] %vm15_vm0, %v659_v15  }
 0x124   :  { %1015 = vst.msk [vmem:[%s2039_s1 + $0x87] ss:$8 sm:$0xf] %vm15_vm0, %v757_v16  }
 0x125   :  { %1016 = vst.msk [vmem:[%s2039_s1 + $0x87] ss:$8 sm:$0xf0] %vm15_vm0, %v757_v16  }
 0x127   :  { %v695_v17 = vpop.permute.xlu1 %694   ;;  %v686_v18 = vpop.permute.xlu0 %685  }
 0x128   :  { %1001 = vst.msk [vmem:[%s2039_s1 + $0x1c6] ss:$8 sm:$0xf] %vm15_vm0, %v695_v17   ;;  %v784_v19 = vpop.permute.xlu2 %783  }
 0x129   :  { %1002 = vst.msk [vmem:[%s2039_s1 + $0x1c6] ss:$8 sm:$0xf0] %vm15_vm0, %v695_v17  }
 0x12a   :  { %999 = vst.msk [vmem:[%s2039_s1 + $0x186] ss:$8 sm:$0xf] %vm15_vm0, %v686_v18  }
 0x12b   :  { %1000 = vst.msk [vmem:[%s2039_s1 + $0x186] ss:$8 sm:$0xf0] %vm15_vm0, %v686_v18  }
 0x12c   :  { %1021 = vst.msk [vmem:[%s2039_s1 + $0x147] ss:$8 sm:$0xf] %vm15_vm0, %v784_v19  }
 0x12d   :  { %1022 = vst.msk [vmem:[%s2039_s1 + $0x147] ss:$8 sm:$0xf0] %vm15_vm0, %v784_v19  }
 0x12f   :  { %v722_v20 = vpop.permute.xlu1 %721   ;;  %v713_v21 = vpop.permute.xlu0 %712  }
 0x130   :  { %1007 = vst.msk [vmem:[%s2039_s1 + $0x286] ss:$8 sm:$0xf] %vm15_vm0, %v722_v20   ;;  %v811_v22 = vpop.permute.xlu2 %810  }
 0x131   :  { %1008 = vst.msk [vmem:[%s2039_s1 + $0x286] ss:$8 sm:$0xf0] %vm15_vm0, %v722_v20  }
 0x132   :  { %1005 = vst.msk [vmem:[%s2039_s1 + $0x246] ss:$8 sm:$0xf] %vm15_vm0, %v713_v21  }
 0x133   :  { %1006 = vst.msk [vmem:[%s2039_s1 + $0x246] ss:$8 sm:$0xf0] %vm15_vm0, %v713_v21  }
 0x134   :  { %1027 = vst.msk [vmem:[%s2039_s1 + $0x207] ss:$8 sm:$0xf] %vm15_vm0, %v811_v22  }
 0x135   :  { %1028 = vst.msk [vmem:[%s2039_s1 + $0x207] ss:$8 sm:$0xf0] %vm15_vm0, %v811_v22  }
 0x137   :  { %v748_v23 = vpop.permute.xlu1 %747   ;;  %v739_v24 = vpop.permute.xlu0 %738  }
 0x138   :  { %1013 = vst.msk [vmem:[%s2039_s1 + $0x47] ss:$8 sm:$0xf] %vm15_vm0, %v748_v23   ;;  %v838_v25 = vpop.permute.xlu2 %837  }
 0x139   :  { %1014 = vst.msk [vmem:[%s2039_s1 + $0x47] ss:$8 sm:$0xf0] %vm15_vm0, %v748_v23  }
 0x13a   :  { %1011 = vst.msk [vmem:[%s2039_s1 + $0x7] ss:$8 sm:$0xf] %vm15_vm0, %v739_v24  }
 0x13b   :  { %1012 = vst.msk [vmem:[%s2039_s1 + $0x7] ss:$8 sm:$0xf0] %vm15_vm0, %v739_v24  }
 0x13c   :  { %1033 = vst.msk [vmem:[%s2039_s1 + $0x2c7] ss:$8 sm:$0xf] %vm15_vm0, %v838_v25  }
 0x13d   :  { %1034 = vst.msk [vmem:[%s2039_s1 + $0x2c7] ss:$8 sm:$0xf0] %vm15_vm0, %v838_v25  }
 0x13f   :  { %v775_v26 = vpop.permute.xlu1 %774   ;;  %v766_v27 = vpop.permute.xlu0 %765  }
 0x140   :  { %1019 = vst.msk [vmem:[%s2039_s1 + $0x107] ss:$8 sm:$0xf] %vm15_vm0, %v775_v26  }
 0x141   :  { %1020 = vst.msk [vmem:[%s2039_s1 + $0x107] ss:$8 sm:$0xf0] %vm15_vm0, %v775_v26  }
 0x142   :  { %1017 = vst.msk [vmem:[%s2039_s1 + $0xc7] ss:$8 sm:$0xf] %vm15_vm0, %v766_v27  }
 0x143   :  { %1018 = vst.msk [vmem:[%s2039_s1 + $0xc7] ss:$8 sm:$0xf0] %vm15_vm0, %v766_v27  }
 0x147   :  { %v802_v28 = vpop.permute.xlu1 %801   ;;  %v793_v29 = vpop.permute.xlu0 %792  }
 0x148   :  { %1025 = vst.msk [vmem:[%s2039_s1 + $0x1c7] ss:$8 sm:$0xf] %vm15_vm0, %v802_v28  }
 0x149   :  { %1026 = vst.msk [vmem:[%s2039_s1 + $0x1c7] ss:$8 sm:$0xf0] %vm15_vm0, %v802_v28  }
 0x14a   :  { %1023 = vst.msk [vmem:[%s2039_s1 + $0x187] ss:$8 sm:$0xf] %vm15_vm0, %v793_v29  }
 0x14b   :  { %1024 = vst.msk [vmem:[%s2039_s1 + $0x187] ss:$8 sm:$0xf0] %vm15_vm0, %v793_v29  }
 0x14f   :  { %v829_v30 = vpop.permute.xlu1 %828   ;;  %v820_v31 = vpop.permute.xlu0 %819  }
 0x150   :  { %1031 = vst.msk [vmem:[%s2039_s1 + $0x287] ss:$8 sm:$0xf] %vm15_vm0, %v829_v30  }
 0x151   :  { %1032 = vst.msk [vmem:[%s2039_s1 + $0x287] ss:$8 sm:$0xf0] %vm15_vm0, %v829_v30  }
 0x152   :  { %1029 = vst.msk [vmem:[%s2039_s1 + $0x247] ss:$8 sm:$0xf] %vm15_vm0, %v820_v31  }
 0x153   :  { %1030 = vst.msk [vmem:[%s2039_s1 + $0x247] ss:$8 sm:$0xf0] %vm15_vm0, %v820_v31  }
 0x154   :  { %844 = vsyncpa [#allocation1], 1 }

// kernel: stark_forward.1
= control target key start
LH: loop header
LB: loop body
LE: loop exit
PB: predicated region body
PF: predicated region fallthrough
CT: control target
= control target key end

     0   :  { %s1811_s0 = inlined_call_operand.vmem [shape: f32[120,128], index: 0, kind: input, shape index: {}]   ;;  %s1812_s1 = inlined_call_operand.vmem [shape: bf16[480,128], index: 1, kind: input, shape index: {}]   ;;  %s1813_s2 = inlined_call_operand.vmem [shape: f32[72,128], index: 2, kind: input, shape index: {}]   ;;  %s1814_s3 = inlined_call_operand.hbm [shape: f32[1,4], index: 3, kind: output, shape index: {}]  }
   0x1   :  { %v1259_v0 = vld [vmem:[%s1812_s1 + $0x38] sm:$0xff]  ;;  %v1258_v1 = vld [vmem:[%s1812_s1 + $0x30] sm:$0xff] }
   0x2   :  { %215 = vmatpush.bf16.msra.mxu1 %v1259_v0 }
   0x3   :  { %8 = vsyncpa [#allocation3], 0  ;;  %v1257_v2 = vld [vmem:[%s1812_s1 + $0x28] sm:$0xff]  ;;  %v1256_v3 = vld [vmem:[%s1812_s1 + $0x20] sm:$0xff]  ;;  %s1370_s26 = smov 32   ;;  %s1371_s14 = smov 96  }
   0x4   :  { %v1255_v4 = vld [vmem:[%s1812_s1 + $0x18] sm:$0xff]  ;;  %v353_v5 = vld [vmem:[%s1813_s2] sm:$0xff]  ;;  %v1254_v6 = vld [vmem:[%s1812_s1 + $0x10] sm:$0xff]  ;;  %vm449_vm0 = vcmask 261120   ;;  %vm117_vm1 = vcmask 654336   ;;  %s1372_s17 = smov 64  }
   0x5   :  { %369 = vrot.lane.b32.xlu0 %v353_v5, %s1370_s26  ;;  %v1253_v7 = vld [vmem:[%s1812_s1 + $0x8] sm:$0xff]  ;;  %v1252_v8 = vld [vmem:[%s1812_s1] sm:$0xff]  ;;  %v139_v12 = vld [vmem:[%s1811_s0 + $0x10] sm:$0xff]  ;;  %vm922_vm3 = vcmask 15360   ;;  %vm1013_vm8 = vcmask 523264   ;;  %vm1064_vm9 = vcmask 8192  }
   0x6   :  { %216 = vmatpush.bf16.msra.mxu1 %v1258_v1  ;;  %v137_v9 = vld [vmem:[%s1811_s0] sm:$0xff]  ;;  %v138_v10 = vld [vmem:[%s1811_s0 + $0x8] sm:$0xff]  ;;  %v140_v13 = vld [vmem:[%s1811_s0 + $0x18] sm:$0xff]  ;;  %s1095_s5 = sshll.u32 %s1814_s3, 4  ;;  %vm1086_vm13 = vcmask 24576   ;;  %s1096_s5 = int_to_ptr.hbm [resolvable:$true] %s1095_s5 }
   0x7   :  { %v145_v11 = vpack.c.bf16 %v138_v10, %v137_v9  ;;  %v146_v14 = vpack.c.bf16 %v140_v13, %v139_v12  ;;  %v1251_v15 = vld [vmem:[%s1812_s1 + $0xd8] sm:$0xff]  ;;  %v354_v16 = vld [vmem:[%s1813_s2 + $0x8] sm:$0xff]  ;;  %v355_v17 = vld [vmem:[%s1813_s2 + $0x10] sm:$0xff] }
   0x8   :  { %86 = vmatpush.bf16.msra.mxu2 %v1251_v15  ;;  %v1250_v18 = vld [vmem:[%s1812_s1 + $0xd0] sm:$0xff]  ;;  %373 = vrot.lane.b32.xlu1 %v355_v17, %s1370_s26  ;;  %v1249_v19 = vld [vmem:[%s1812_s1 + $0xc8] sm:$0xff]  ;;  %v356_v20 = vld [vmem:[%s1813_s2 + $0x18] sm:$0xff] }
   0x9   :  { %v141_v21 = vld [vmem:[%s1811_s0 + $0x20] sm:$0xff]  ;;  %v142_v22 = vld [vmem:[%s1811_s0 + $0x28] sm:$0xff]  ;;  %v1247_v25 = vld [vmem:[%s1812_s1 + $0xb8] sm:$0xff] }
   0xa   :  { %217 = vmatpush.bf16.msra.mxu1 %v1257_v2  ;;  %v1248_v23 = vld [vmem:[%s1812_s1 + $0xc0] sm:$0xff]  ;;  %v147_v24 = vpack.c.bf16 %v142_v22, %v141_v21  ;;  %v358_v26 = vld [vmem:[%s1813_s2 + $0x28] sm:$0xff]  ;;  %v1246_v29 = vld [vmem:[%s1812_s1 + $0xb0] sm:$0xff] }
   0xb   :  { %v357_v27 = vld [vmem:[%s1813_s2 + $0x20] sm:$0xff]  ;;  %v1245_v30 = vld [vmem:[%s1812_s1 + $0xa8] sm:$0xff]  ;;  %v359_v31 = vld [vmem:[%s1813_s2 + $0x30] sm:$0xff] }
   0xc   :  { %87 = vmatpush.bf16.msra.mxu2 %v1250_v18  ;;  %v1478_v28 = vld [vmem:[%s1811_s0 + $0x60] sm:$0xff]  ;;  %v1496_v32 = vld [vmem:[%s1811_s0 + $0x68] sm:$0xff]  ;;  %v143_v33 = vld [vmem:[%s1811_s0 + $0x30] sm:$0xff] }
   0xd   :  { %371 = vrot.lane.b32.xlu0 %v354_v16, %s1370_s26  ;;  %387 = vrot.lane.b32.xlu2 %v1478_v28, %s1371_s14  ;;  %v144_v34 = vld [vmem:[%s1811_s0 + $0x38] sm:$0xff]  ;;  %v1244_v35 = vld [vmem:[%s1812_s1 + $0xa0] sm:$0xff] }
   0xe   :  { %218 = vmatpush.bf16.msra.mxu1 %v1256_v3  ;;  %v16_v36 = vld [vmem:[%s1811_s0 + $0x40] sm:$0xff]  ;;  %v17_v37 = vld [vmem:[%s1811_s0 + $0x48] sm:$0xff]  ;;  %v1267_v38 = vld [vmem:[%s1812_s1 + $0x78] sm:$0xff]  ;;  %v148_v39 = vpack.c.bf16 %v144_v34, %v143_v33 }
   0xf   :  { %v20_v40 = vpack.c.bf16 %v17_v37, %v16_v36  ;;  %v1266_v41 = vld [vmem:[%s1812_s1 + $0x70] sm:$0xff]  ;;  %v1265_v42 = vld [vmem:[%s1812_s1 + $0x68] sm:$0xff]  ;;  %v1264_v43 = vld [vmem:[%s1812_s1 + $0x60] sm:$0xff] }
  0x10   :  { %88 = vmatpush.bf16.msra.mxu2 %v1249_v19  ;;  %375 = vrot.lane.b32.xlu1 %v356_v20, %s1370_s26  ;;  %v18_v44 = vld [vmem:[%s1811_s0 + $0x50] sm:$0xff]  ;;  %v19_v45 = vld [vmem:[%s1811_s0 + $0x58] sm:$0xff]  ;;  %v1261_v49 = vld [vmem:[%s1812_s1 + $0x48] sm:$0xff] }
  0x11   :  { %v21_v46 = vpack.c.bf16 %v19_v45, %v18_v44  ;;  %v1263_v47 = vld [vmem:[%s1812_s1 + $0x58] sm:$0xff]  ;;  %v1262_v48 = vld [vmem:[%s1812_s1 + $0x50] sm:$0xff]  ;;  %v1260_v50 = vld [vmem:[%s1812_s1 + $0x40] sm:$0xff] }
  0x12   :  { %219 = vmatpush.bf16.msra.mxu1 %v1255_v4  ;;  %v360_v52 = vld [vmem:[%s1813_s2 + $0x38] sm:$0xff]  ;;  %v1290_v54 = vld [vmem:[%s1813_s2 + $0x40] ss:$0 sm:$0xff] }
  0x13   :  { %v1567_v12 = vld [vmem:[%s1812_s1 + $0x80] sm:$0xff] }
  0x14   :  { %89 = vmatpush.bf16.msra.mxu2 %v1248_v23 }
  0x15   :  { %377 = vrot.lane.b32.xlu0 %v357_v27, %s1370_s26  ;;  %389 = vrot.lane.b32.xlu2 %v1496_v32, %s1371_s14 }
  0x16   :  { %220 = vmatpush.bf16.msra.mxu1 %v1254_v6 }
  0x18   :  { %90 = vmatpush.bf16.msra.mxu2 %v1247_v25  ;;  %379 = vrot.lane.b32.xlu1 %v358_v26, %s1370_s26  ;;  %v1280_v25 = vld [vmem:[%s1812_s1 + $0xe0] sm:$0xff]  }
  0x19   :  { %v1275_v36 = vunpack.c.h.bf16 %v1280_v25 }
  0x1a   :  { %221 = vmatpush.bf16.msra.mxu1 %v1253_v7 }
  0x1c   :  { %91 = vmatpush.bf16.msra.mxu2 %v1246_v29 }
  0x1e   :  { %222 = vmatpush.bf16.msra.mxu1 %v1252_v8  ;;  %v1560_v8 = vld [vmem:[%s1812_s1 + $0x88] sm:$0xff] }
  0x1f   :  { %471 = vmatpush.bf16.msra.mxu3 %v1560_v8 }
  0x20   :  { %92 = vmatpush.bf16.msra.mxu2 %v1245_v30  ;;  %381 = vrot.lane.b32.xlu1 %v359_v31, %s1370_s26  ;;  %v1274_v30 = vunpack.c.l.bf16 %v1280_v25 }
  0x21   :  { %223 = vmatmul.bf16.vlgmr.msra.gmra.mxu1 %v145_v11 }
  0x23   :  { %472 = vmatpush.bf16.msra.mxu3 %v1567_v12 }
  0x24   :  { %93 = vmatpush.bf16.msra.mxu2 %v1244_v35 }
  0x27   :  { %94 = vmatmul.bf16.vlgmr.msra.gmra.mxu2 %v20_v40 }
  0x28   :  { %322 = vmatpush.bf16.msrb.mxu2 %v1267_v38 }
  0x2c   :  { %323 = vmatpush.bf16.msrb.mxu2 %v1266_v41  ;;  %v1582_v41 = vld [vmem:[%s1812_s1 + $0xe8] sm:$0xff]  }
  0x2d   :  { %v1278_v44 = vunpack.c.l.bf16 %v1582_v41 }
  0x30   :  { %324 = vmatpush.bf16.msrb.mxu2 %v1265_v42 }
  0x31   :  { %228 = vmatmul.bf16.gmra.mxu1 %v146_v14 }
  0x34   :  { %325 = vmatpush.bf16.msrb.mxu2 %v1264_v43 }
  0x37   :  { %99 = vmatmul.bf16.gmra.mxu2 %v21_v46 }
  0x38   :  { %326 = vmatpush.bf16.msrb.mxu2 %v1263_v47 }
  0x3c   :  { %327 = vmatpush.bf16.msrb.mxu2 %v1262_v48 }
  0x40   :  { %328 = vmatpush.bf16.msrb.mxu2 %v1261_v49 }
  0x41   :  { %233 = vmatmul.bf16.gmra.mxu1 %v147_v24 }
  0x44   :  { %329 = vmatpush.bf16.msrb.mxu2 %v1260_v50 }
  0x51   :  { %238 = vmatmul.bf16.gmra.mxu1 %v148_v39 }
  0x67   :  { %v388_v7 = vpop.permute.xlu2 %387 }
  0x68   :  { %v417_v13 = vadd.f32 %v388_v7, %v1478_v28 }
  0x6f   :  { %v390_v15 = vpop.permute.xlu2 %389 }
  0x70   :  { %v418_v17 = vadd.f32 %v390_v15, %v1496_v32 }
  0x72   :  { %v428_v20 = vpack.c.bf16 %v418_v17, %v417_v13 }
  0x74   :  { %1208 = vmatmul.msk.bf16.vlgmr.msra.gmra.mxu3 %vm449_vm0, %v428_v20 }
  0x77   :  { %v370_v51 = vpop.permute.xlu0 %369 }
  0x78   :  { %391 = vrot.lane.b32.xlu2 %v370_v51, %s1371_s14 }
  0x7a   :  { %v374_v63 = vpop.permute.xlu1 %373 }
  0x7f   :  { %v372_v58 = vpop.permute.xlu0 %371 }
  0x80   :  { %383 = vrot.lane.b32.xlu2 %v360_v52, %s1370_s26  ;;  %393 = vrot.lane.b32.xlu0 %v372_v58, %s1371_s14 }
  0x82   :  { %v376_v3 = vpop.permute.xlu1 %375 }
  0x83   :  { %397 = vrot.lane.b32.xlu1 %v376_v3, %s1371_s14 }
  0x87   :  { %v378_v9 = vpop.permute.xlu0 %377 }
  0x88   :  { %395 = vrot.lane.b32.xlu0 %v374_v63, %s1371_s14  ;;  %399 = vrot.lane.b32.xlu2 %v378_v9, %s1371_s14 }
  0x8a   :  { %v380_v11 = vpop.permute.xlu1 %379 }
  0x90   :  { %401 = vrot.lane.b32.xlu0 %v380_v11, %s1371_s14 }
  0x92   :  { %v382_v19 = vpop.permute.xlu1 %381 }
  0x93   :  { %403 = vrot.lane.b32.xlu1 %v382_v19, %s1371_s14 }
  0x9e   :  { %v224_v53 = vpop.f32.mrf.mxu1 }
  0x9f   :  { %v225_v55 = vadd.f32 %v1290_v54, %v224_v53  ;;  %v1291_v53 = vld [vmem:[%s1813_s2 + $0x41] ss:$0 sm:$0xff] }
  0xa1   :  { %v244_v59 = vmax.f32 %v225_v55, 0.0 }
  0xa6   :  { %v226_v56 = vpop.f32.mrf.mxu1 }
  0xa7   :  { %v227_v57 = vadd.f32 %v1290_v54, %v226_v56 }
  0xa9   :  { %v245_v60 = vmax.f32 %v227_v57, 0.0 }
  0xaa   :  { %v95_v27 = vpop.f32.mrf.mxu2 }
  0xab   :  { %v252_v61 = vpack.c.bf16 %v245_v60, %v244_v59  ;;  %v113_v35 = vmul.f32 %v1274_v30, %v95_v27 }
  0xad   :  { %330 = vmatmul.bf16.vlgmr.msrb.gmra.mxu2 %v252_v61  ;;  %v118_v39 = vsel %vm117_vm1, %v113_v35, 0.0 }
  0xae   :  { %v229_v62 = vpop.f32.mrf.mxu1 }
  0xaf   :  { %v230_v0 = vadd.f32 %v1290_v54, %v229_v62 }
  0xb1   :  { %v246_v4 = vmax.f32 %v230_v0, 0.0 }
  0xb2   :  { %v97_v38 = vpop.f32.mrf.mxu2 }
  0xb3   :  { %v114_v40 = vmul.f32 %v1275_v36, %v97_v38 }
  0xb5   :  { %v119_v42 = vsel %vm117_vm1, %v114_v40, 0.0 }
  0xb6   :  { %v231_v1 = vpop.f32.mrf.mxu1  ;;  %v120_v43 = vadd.f32 %v119_v42, %v118_v39 }
  0xb7   :  { %v232_v2 = vadd.f32 %v1290_v54, %v231_v1 }
  0xb9   :  { %v247_v5 = vmax.f32 %v232_v2, 0.0 }
  0xba   :  { %v100_v45 = vpop.f32.mrf.mxu2 }
  0xbb   :  { %v253_v6 = vpack.c.bf16 %v247_v5, %v246_v4  ;;  %v115_v46 = vmul.f32 %v1278_v44, %v100_v45 }
  0xbd   :  { %335 = vmatmul.bf16.gmra.mxu2 %v253_v6  ;;  %v121_v48 = vsel %vm117_vm1, %v115_v46, 0.0 }
  0xbe   :  { %v234_v10 = vpop.f32.mrf.mxu1  ;;  %v1587_v49 = vadd.f32 %v121_v48, %v120_v43 }
  0xbf   :  { %v235_v14 = vadd.f32 %v1290_v54, %v234_v10 }
  0xc1   :  { %v248_v21 = vmax.f32 %v235_v14, 0.0 }
  0xc2   :  { %v1590_v51 = vpop.f32.mrf.mxu2 }
  0xc6   :  { %v236_v16 = vpop.f32.mrf.mxu1 }
  0xc7   :  { %v237_v18 = vadd.f32 %v1290_v54, %v236_v16 }
  0xc9   :  { %v249_v22 = vmax.f32 %v237_v18, 0.0 }
  0xcb   :  { %v254_v23 = vpack.c.bf16 %v249_v22, %v248_v21 }
  0xcd   :  { %340 = vmatmul.bf16.gmra.mxu2 %v254_v23 }
  0xce   :  { %v239_v24 = vpop.f32.mrf.mxu1 }
  0xcf   :  { %v240_v26 = vadd.f32 %v1290_v54, %v239_v24 }
  0xd1   :  { %v250_v33 = vmax.f32 %v240_v26, 0.0 }
  0xd2   :  { %v392_v47 = vpop.permute.xlu2 %391 }
  0xd6   :  { %v241_v29 = vpop.f32.mrf.mxu1 }
  0xd7   :  { %v242_v31 = vadd.f32 %v1290_v54, %v241_v29 }
  0xd9   :  { %v251_v34 = vmax.f32 %v242_v31, 0.0 }
  0xda   :  { %v384_v50 = vpop.permute.xlu2 %383 }
  0xdb   :  { %v255_v37 = vpack.c.bf16 %v251_v34, %v250_v33  ;;  %405 = vrot.lane.b32.xlu2 %v384_v50, %s1371_s14 }
  0xdd   :  { %345 = vmatmul.bf16.gmra.mxu2 %v255_v37  ;;  %v1634_v37 = vld [vmem:[%s1813_s2 + $0x42] ss:$0 sm:$0xff] }
  0xe2   :  { %v400_v11 = vpop.permute.xlu2 %399 }
  0xf2   :  { %v394_v56 = vpop.permute.xlu0 %393 }
  0xf5   :  { %v398_v2 = vpop.permute.xlu1 %397 }
  0xf7   :  { %v474_v31 = vpop.f32.mrf.mxu3 }
  0xf8   :  { %v508_v48 = vadd.f32 %v1634_v37, %v474_v31 }
  0xfa   :  { %v396_v0 = vpop.permute.xlu0 %395 }
  0xff   :  { %v476_v33 = vpop.f32.mrf.mxu3 }
 0x100   :  { %v509_v50 = vadd.f32 %v1634_v37, %v476_v33 }
 0x102   :  { %v402_v14 = vpop.permute.xlu0 %401 }
 0x105   :  { %v404_v22 = vpop.permute.xlu1 %403 }
 0x130   :  { %v331_v52 = vpop.f32.mrf.mxu2 }
 0x131   :  { %v1595_v54 = vadd.f32 %v1291_v53, %v331_v52 }
 0x133   :  { %v419_v58 = vadd.f32 %v392_v47, %v1595_v54 }
 0x135   :  { %v406_v24 = vpop.permute.xlu2 %405 }
 0x138   :  { %v333_v55 = vpop.f32.mrf.mxu2 }
 0x139   :  { %v1597_v57 = vadd.f32 %v1291_v53, %v333_v55 }
 0x13b   :  { %v511_v59 = vpack.c.bf16 %v1597_v57, %v1595_v54  ;;  %v420_v60 = vadd.f32 %v394_v56, %v1597_v57 }
 0x13d   :  { %v429_v61 = vpack.c.bf16 %v420_v60, %v419_v58 }
 0x13f   :  { %1209 = vmatmul.msk.bf16.gmra.mxu3 %vm449_vm0, %v429_v61 }
 0x140   :  { %v336_v62 = vpop.f32.mrf.mxu2 }
 0x141   :  { %v1604_v63 = vadd.f32 %v1291_v53, %v336_v62 }
 0x143   :  { %v421_v4 = vadd.f32 %v396_v0, %v1604_v63 }
 0x148   :  { %v338_v1 = vpop.f32.mrf.mxu2 }
 0x149   :  { %v1606_v3 = vadd.f32 %v1291_v53, %v338_v1 }
 0x14b   :  { %v512_v5 = vpack.c.bf16 %v1606_v3, %v1604_v63  ;;  %v422_v6 = vadd.f32 %v398_v2, %v1606_v3 }
 0x14d   :  { %v430_v7 = vpack.c.bf16 %v422_v6, %v421_v4 }
 0x14f   :  { %1210 = vmatmul.msk.bf16.gmra.mxu3 %vm449_vm0, %v430_v7 }
 0x150   :  { %v341_v9 = vpop.f32.mrf.mxu2 }
 0x151   :  { %v1613_v10 = vadd.f32 %v1291_v53, %v341_v9 }
 0x153   :  { %v423_v16 = vadd.f32 %v400_v11, %v1613_v10 }
 0x158   :  { %v343_v13 = vpop.f32.mrf.mxu2 }
 0x159   :  { %v1615_v15 = vadd.f32 %v1291_v53, %v343_v13 }
 0x15b   :  { %v513_v17 = vpack.c.bf16 %v1615_v15, %v1613_v10  ;;  %v424_v18 = vadd.f32 %v402_v14, %v1615_v15  ;;  %v510_v14 = vpack.c.bf16 %v1496_v32, %v1478_v28  ;;  %v1279_v28 = vunpack.c.h.bf16 %v1582_v41  ;;  %v133_v41 = vld [vmem:[%s1811_s0 + $0x70] sm:$0x1] }
 0x15d   :  { %v431_v19 = vpack.c.bf16 %v424_v18, %v423_v16  ;;  %v116_v32 = vmul.f32 %v1279_v28, %v1590_v51  ;;  %v1373_v51 = vmov 0.0  }
 0x15f   :  { %1211 = vmatmul.msk.bf16.gmra.mxu3 %vm449_vm0, %v431_v19  ;;  %v123_v54 = vsel %vm117_vm1, %v116_v32, 0.0 }
 0x160   :  { %v346_v20 = vpop.f32.mrf.mxu2  ;;  %v124_v57 = vadd.f32 %v123_v54, %v1587_v49 }
 0x161   :  { %v1622_v21 = vadd.f32 %v1291_v53, %v346_v20 }
 0x163   :  { %v425_v26 = vadd.f32 %v404_v22, %v1622_v21 }
 0x168   :  { %v348_v23 = vpop.f32.mrf.mxu2 }
 0x169   :  { %v1624_v25 = vadd.f32 %v1291_v53, %v348_v23  ;;  %v578_v53 = vpack.c.bf16 %v509_v50, %v508_v48 }
 0x16b   :  { %v514_v27 = vpack.c.bf16 %v1624_v25, %v1622_v21  ;;  %v426_v29 = vadd.f32 %v406_v24, %v1624_v25 }
 0x16d   :  { %v432_v30 = vpack.c.bf16 %v426_v29, %v425_v26 }
 0x16f   :  { %1212 = vmatmul.msk.bf16.gmra.mxu3 %vm449_vm0, %v432_v30 }
 0x1c2   :  { %v479_v34 = vpop.f32.mrf.mxu3 }
 0x1c3   :  { %v500_v62 = vadd.f32 %v1634_v37, %v479_v34 }
 0x1ca   :  { %v481_v35 = vpop.f32.mrf.mxu3 }
 0x1cb   :  { %v501_v61 = vadd.f32 %v1634_v37, %v481_v35 }
 0x1cd   :  { %v574_v0 = vpack.c.bf16 %v501_v61, %v500_v62 }
 0x1d2   :  { %v484_v36 = vpop.f32.mrf.mxu3 }
 0x1d3   :  { %v502_v39 = vadd.f32 %v1634_v37, %v484_v36 }
 0x1da   :  { %v486_v38 = vpop.f32.mrf.mxu3 }
 0x1db   :  { %v503_v40 = vadd.f32 %v1634_v37, %v486_v38 }
 0x1dd   :  { %v575_v42 = vpack.c.bf16 %v503_v40, %v502_v39 }
 0x1df   :  { %588 = vrot.lane.b32.xlu2 %v575_v42, %s1371_s14 }
 0x1e2   :  { %v489_v43 = vpop.f32.mrf.mxu3 }
 0x1e3   :  { %v504_v45 = vadd.f32 %v1634_v37, %v489_v43 }
 0x1e7   :  { %517 = vrot.lane.b32.xlu2 %v1560_v8, %s1372_s17 }
 0x1ea   :  { %v491_v44 = vpop.f32.mrf.mxu3 }
 0x1eb   :  { %v505_v46 = vadd.f32 %v1634_v37, %v491_v44 }
 0x1ed   :  { %v576_v47 = vpack.c.bf16 %v505_v46, %v504_v45 }
 0x1ef   :  { %590 = vrot.lane.b32.xlu1 %v576_v47, %s1371_s14 }
 0x1f2   :  { %v494_v52 = vpop.f32.mrf.mxu3 }
 0x1f3   :  { %v506_v56 = vadd.f32 %v1634_v37, %v494_v52 }
 0x1f7   :  { %584 = vrot.lane.b32.xlu1 %v578_v53, %s1371_s14 }
 0x1fa   :  { %v496_v55 = vpop.f32.mrf.mxu3 }
 0x1fb   :  { %v507_v58 = vadd.f32 %v1634_v37, %v496_v55 }
 0x1fd   :  { %v577_v60 = vpack.c.bf16 %v507_v58, %v506_v56 }
 0x1ff   :  { %592 = vrot.lane.b32.xlu0 %v577_v60, %s1371_s14 }
 0x207   :  { %586 = vrot.lane.b32.xlu0 %v574_v0, %s1371_s14 }
 0x20f   :  { %515 = vrot.lane.b32.xlu0 %v1567_v12, %s1372_s17 }
 0x239   :  { %v589_v1 = vpop.permute.xlu2 %588 }
 0x23a   :  { %v613_v16 = vsel %vm449_vm0, %v589_v1, 0 }
 0x241   :  { %v518_v2 = vpop.permute.xlu2 %517 }
 0x242   :  { %546 = vmatpush.bf16.msra.mxu0 %v518_v2 }
 0x261   :  { %v591_v7 = vpop.permute.xlu1 %590 }
 0x262   :  { %v616_v11 = vsel %vm449_vm0, %v591_v7, 0 }
 0x269   :  { %v585_v19 = vpop.permute.xlu1 %584 }
 0x26a   :  { %v607_v20 = vsel %vm449_vm0, %v585_v19, 0 }
 0x271   :  { %v593_v4 = vpop.permute.xlu0 %592 }
 0x272   :  { %v619_v6 = vsel %vm449_vm0, %v593_v4, 0 }
 0x273   :  { %624 = vmatpush.bf16.xpose.msrb.mxu3 %v619_v6 }
 0x279   :  { %v587_v9 = vpop.permute.xlu0 %586 }
 0x27a   :  { %v610_v18 = vsel %vm449_vm0, %v587_v9, 0 }
 0x27b   :  { %625 = vmatpush.bf16.xpose.msrb.mxu3 %v616_v11 }
 0x281   :  { %v516_v13 = vpop.permute.xlu0 %515 }
 0x282   :  { %547 = vmatpush.bf16.msra.mxu0 %v516_v13 }
 0x283   :  { %626 = vmatpush.bf16.xpose.msrb.mxu3 %v613_v16 }
 0x285   :  { %1213 = vmatmul.msk.bf16.vlgmr.msra.gmra.mxu0 %vm449_vm0, %v510_v14 }
 0x28b   :  { %627 = vmatpush.bf16.xpose.msrb.mxu3 %v610_v18 }
 0x293   :  { %628 = vmatpush.bf16.xpose.msrb.mxu3 %v607_v20 }
 0x295   :  { %1214 = vmatmul.msk.bf16.gmra.mxu0 %vm449_vm0, %v511_v59  ;;  %v125_v59 = vrot.slane %v124_v57, 4 }
 0x297   :  { %v126_v63 = vadd.f32 %v125_v59, %v124_v57 }
 0x299   :  { %v127_v3 = vrot.slane %v126_v63, 2 }
 0x29a   :  { %1218 = vmatmul.msk.bf16.vlgmr.msrb.gmra.mxu3 %vm449_vm0, %v574_v0 }
 0x2a5   :  { %1215 = vmatmul.msk.bf16.gmra.mxu0 %vm449_vm0, %v512_v5  ;;  %v128_v5 = vadd.f32 %v127_v3, %v126_v63 }
 0x2a7   :  { %v129_v10 = vrot.slane %v128_v5, 1 }
 0x2a9   :  { %v130_v15 = vadd.f32 %v129_v10, %v128_v5 }
 0x2aa   :  { %1219 = vmatmul.msk.bf16.gmra.mxu3 %vm449_vm0, %v575_v42 }
 0x2b5   :  { %1216 = vmatmul.msk.bf16.gmra.mxu0 %vm449_vm0, %v513_v17  ;;  %v131_v17 = vld [vmem:[%s1813_s2 + $0x46] sm:$0x1] }
 0x2b6   :  { %v132_v21 = vadd.f32 %v131_v17, %v130_v15 }
 0x2b8   :  { %vm134_vm2 = vcmp.lt.f32.partialorder %v132_v21, 0.5 }
 0x2b9   :  { %v135_v22 = vsel %vm134_vm2, -1e+09, %v1373_v51 }
 0x2ba   :  { %1220 = vmatmul.msk.bf16.gmra.mxu3 %vm449_vm0, %v576_v47  ;;  %v136_v23 = vadd.f32 %v135_v22, %v133_v41 }
 0x2bc   :  { %v658_v24 = vperm.slane %v136_v23, 0 }
 0x2c5   :  { %1217 = vmatmul.msk.bf16.gmra.mxu0 %vm449_vm0, %v514_v27 }
 0x2ca   :  { %1221 = vmatmul.msk.bf16.gmra.mxu3 %vm449_vm0, %v577_v60 }
 0x302   :  { %v1712_v2 = vpop.f32.mrf.mxu0 }
 0x30a   :  { %v1714_v4 = vpop.f32.mrf.mxu0 }
 0x312   :  { %v554_v6 = vpop.f32.mrf.mxu0 }
 0x31a   :  { %v556_v7 = vpop.f32.mrf.mxu0 }
 0x31d   :  { %v630_v49 = vpop.f32.mrf.mxu3 }
 0x31e   :  { %v650_v25 = vmul.f32 0.17677669, %v630_v49 }
 0x320   :  { %v659_v26 = vadd.f32 %v658_v24, %v650_v25 }
 0x322   :  { %v667_v27 = vsel %vm117_vm1, %v659_v26, -inf  ;;  %v559_v9 = vpop.f32.mrf.mxu0 }
 0x323   :  { %668 = vmax.xlane.f32.xlu1 %v667_v27 }
 0x325   :  { %v632_v29 = vpop.f32.mrf.mxu3 }
 0x326   :  { %v651_v30 = vmul.f32 0.17677669, %v632_v29 }
 0x328   :  { %v660_v31 = vadd.f32 %v658_v24, %v651_v30 }
 0x32a   :  { %v670_v33 = vsel %vm117_vm1, %v660_v31, -inf  ;;  %v561_v11 = vpop.f32.mrf.mxu0 }
 0x32b   :  { %671 = vmax.xlane.f32.xlu2 %v670_v33 }
 0x32d   :  { %v635_v34 = vpop.f32.mrf.mxu3 }
 0x32e   :  { %v652_v35 = vmul.f32 0.17677669, %v635_v34 }
 0x330   :  { %v661_v36 = vadd.f32 %v658_v24, %v652_v35 }
 0x332   :  { %v673_v38 = vsel %vm117_vm1, %v661_v36, -inf  ;;  %v564_v18 = vpop.f32.mrf.mxu0 }
 0x333   :  { %674 = vmax.xlane.f32.xlu0 %v673_v38 }
 0x335   :  { %v637_v39 = vpop.f32.mrf.mxu3 }
 0x336   :  { %v653_v40 = vmul.f32 0.17677669, %v637_v39 }
 0x338   :  { %v662_v42 = vadd.f32 %v658_v24, %v653_v40 }
 0x33a   :  { %v676_v43 = vsel %vm117_vm1, %v662_v42, -inf  ;;  %v566_v57 = vpop.f32.mrf.mxu0 }
 0x33b   :  { %677 = vmax.xlane.f32.xlu2 %v676_v43 }
 0x33d   :  { %v640_v44 = vpop.f32.mrf.mxu3 }
 0x33e   :  { %v654_v45 = vmul.f32 0.17677669, %v640_v44 }
 0x340   :  { %v663_v46 = vadd.f32 %v658_v24, %v654_v45 }
 0x342   :  { %v679_v47 = vsel %vm117_vm1, %v663_v46, -inf  ;;  %v569_v17 = vpop.f32.mrf.mxu0 }
 0x343   :  { %680 = vmax.xlane.f32.xlu1 %v679_v47 }
 0x345   :  { %v642_v48 = vpop.f32.mrf.mxu3 }
 0x346   :  { %v655_v50 = vmul.f32 0.17677669, %v642_v48 }
 0x347   :  { %522 = vrot.lane.b32.xlu0 %v1634_v37, %s1372_s17 }
 0x348   :  { %v1700_v52 = vadd.f32 %v658_v24, %v655_v50 }
 0x34a   :  { %v682_v53 = vsel %vm117_vm1, %v1700_v52, -inf  ;;  %v571_v25 = vpop.f32.mrf.mxu0 }
 0x34b   :  { %683 = vmax.xlane.f32.xlu2 %v682_v53 }
 0x34d   :  { %v645_v55 = vpop.f32.mrf.mxu3 }
 0x34e   :  { %v656_v56 = vmul.f32 0.17677669, %v645_v55 }
 0x350   :  { %v1704_v58 = vadd.f32 %v658_v24, %v656_v56 }
 0x352   :  { %v685_v60 = vsel %vm117_vm1, %v1704_v58, -inf }
 0x353   :  { %686 = vmax.xlane.f32.xlu1 %v685_v60 }
 0x355   :  { %v647_v61 = vpop.f32.mrf.mxu3 }
 0x356   :  { %v657_v62 = vmul.f32 0.17677669, %v647_v61 }
 0x358   :  { %v1708_v0 = vadd.f32 %v658_v24, %v657_v62 }
 0x35a   :  { %v688_v1 = vsel %vm117_vm1, %v1708_v0, -inf }
 0x35b   :  { %689 = vmax.xlane.f32.xlu2 %v688_v1 }
 0x396   :  { %v669_v13 = vpop.xlane.xlu1 %668 }
 0x397   :  { %v691_v14 = vsub.f32 %v659_v26, %v669_v13 }
 0x399   :  { %v699_v16 = vmul.f32 1.442695, %v691_v14 }
 0x39b   :  { %1294 = vpow2.f32 %v699_v16 }
 0x39e   :  { %v672_v19 = vpop.xlane.xlu2 %671 }
 0x39f   :  { %v692_v20 = vsub.f32 %v660_v31, %v672_v19 }
 0x3a1   :  { %v1716_v28 = vpop.eup %1294  ;;  %v701_v32 = vmul.f32 1.442695, %v692_v20 }
 0x3a2   :  { %v715_v54 = vsel %vm117_vm1, %v1716_v28, 0.0 }
 0x3a3   :  { %1296 = vpow2.f32 %v701_v32  ;;  %716 = vadd.xlane.f32.xlu1 %v715_v54 }
 0x3a6   :  { %v675_v59 = vpop.xlane.xlu0 %674 }
 0x3a7   :  { %v693_v63 = vsub.f32 %v661_v36, %v675_v59 }
 0x3a9   :  { %v1720_v3 = vpop.eup %1296  ;;  %v703_v5 = vmul.f32 1.442695, %v693_v63 }
 0x3aa   :  { %v718_v10 = vsel %vm117_vm1, %v1720_v3, 0.0 }
 0x3ab   :  { %1298 = vpow2.f32 %v703_v5  ;;  %719 = vadd.xlane.f32.xlu2 %v718_v10 }
 0x3ae   :  { %v678_v15 = vpop.xlane.xlu2 %677 }
 0x3af   :  { %v694_v21 = vsub.f32 %v662_v42, %v678_v15 }
 0x3b1   :  { %v1724_v41 = vpop.eup %1298  ;;  %v705_v51 = vmul.f32 1.442695, %v694_v21 }
 0x3b2   :  { %v721_v22 = vsel %vm117_vm1, %v1724_v41, 0.0 }
 0x3b3   :  { %1300 = vpow2.f32 %v705_v51  ;;  %722 = vadd.xlane.f32.xlu1 %v721_v22 }
 0x3b6   :  { %v681_v23 = vpop.xlane.xlu1 %680 }
 0x3b7   :  { %v695_v49 = vsub.f32 %v663_v46, %v681_v23 }
 0x3b9   :  { %v1728_v24 = vpop.eup %1300  ;;  %v707_v26 = vmul.f32 1.442695, %v695_v49  ;;  %v523_v27 = vpop.permute.xlu0 %522 }
 0x3ba   :  { %v724_v29 = vsel %vm117_vm1, %v1728_v24, 0.0  ;;  %v570_v30 = vadd.f32 %v569_v17, %v523_v27  ;;  %v572_v31 = vadd.f32 %v571_v25, %v523_v27  ;;  %v565_v34 = vadd.f32 %v564_v18, %v523_v27 }
 0x3bb   :  { %1302 = vpow2.f32 %v707_v26  ;;  %725 = vadd.xlane.f32.xlu0 %v724_v29  ;;  %v567_v35 = vadd.f32 %v566_v57, %v523_v27  ;;  %v560_v40 = vadd.f32 %v559_v9, %v523_v27  ;;  %v562_v42 = vadd.f32 %v561_v11, %v523_v27 }
 0x3bc   :  { %v763_v33 = vpack.c.bf16 %v572_v31, %v570_v30  ;;  %v555_v47 = vadd.f32 %v554_v6, %v523_v27  ;;  %v557_v48 = vadd.f32 %v556_v7, %v523_v27  ;;  %v550_v53 = vadd.f32 %v1712_v2, %v523_v27 }
 0x3bd   :  { %v762_v39 = vpack.c.bf16 %v567_v35, %v565_v34  ;;  %v761_v46 = vpack.c.bf16 %v562_v42, %v560_v40 }
 0x3be   :  { %779 = vmatpush.bf16.msrb.mxu1 %v763_v33  ;;  %v684_v36 = vpop.xlane.xlu2 %683  ;;  %v760_v56 = vpack.c.bf16 %v557_v48, %v555_v47 }
 0x3bf   :  { %v696_v38 = vsub.f32 %v1700_v52, %v684_v36  ;;  %v552_v52 = vadd.f32 %v1714_v4, %v523_v27 }
 0x3c1   :  { %v1733_v43 = vpop.eup %1302  ;;  %v709_v44 = vmul.f32 1.442695, %v696_v38  ;;  %v759_v1 = vpack.c.bf16 %v552_v52, %v550_v53 }
 0x3c2   :  { %780 = vmatpush.bf16.msrb.mxu1 %v762_v39  ;;  %v727_v45 = vsel %vm117_vm1, %v1733_v43, 0.0 }
 0x3c3   :  { %1304 = vpow2.f32 %v709_v44  ;;  %728 = vadd.xlane.f32.xlu2 %v727_v45  ;;  %v1270_v44 = vld [vmem:[%s1812_s1 + $0x90] sm:$0xff] }
 0x3c6   :  { %781 = vmatpush.bf16.msrb.mxu1 %v761_v46  ;;  %v687_v50 = vpop.xlane.xlu1 %686 }
 0x3c7   :  { %v697_v55 = vsub.f32 %v1704_v58, %v687_v50 }
 0x3c9   :  { %v1305_v60 = vpop.eup %1304  ;;  %v711_v61 = vmul.f32 1.442695, %v697_v55 }
 0x3ca   :  { %782 = vmatpush.bf16.msrb.mxu1 %v760_v56  ;;  %v730_v62 = vsel %vm117_vm1, %v1305_v60, 0.0 }
 0x3cb   :  { %1306 = vpow2.f32 %v711_v61  ;;  %731 = vadd.xlane.f32.xlu1 %v730_v62 }
 0x3ce   :  { %v690_v9 = vpop.xlane.xlu2 %689  ;;  %783 = vmatpush.bf16.msrb.mxu1 %v759_v1 }
 0x3cf   :  { %v698_v6 = vsub.f32 %v1708_v0, %v690_v9  ;;  %815 = vrot.lane.b32.xlu0 %v1634_v37, %s1370_s26 }
 0x3d1   :  { %v1307_v2 = vpop.eup %1306  ;;  %v713_v4 = vmul.f32 1.442695, %v698_v6 }
 0x3d2   :  { %v733_v58 = vsel %vm117_vm1, %v1307_v2, 0.0 }
 0x3d3   :  { %1308 = vpow2.f32 %v713_v4  ;;  %734 = vadd.xlane.f32.xlu2 %v733_v58 }
 0x3d9   :  { %v1309_v7 = vpop.eup %1308 }
 0x3da   :  { %v736_v11 = vsel %vm117_vm1, %v1309_v7, 0.0 }
 0x3db   :  { %737 = vadd.xlane.f32.xlu1 %v736_v11 }
 0x3eb   :  { %811 = vrot.lane.b32.xlu2 %v1560_v8, %s1370_s26 }
 0x3f4   :  { %809 = vrot.lane.b32.xlu1 %v1567_v12, %s1370_s26 }
 0x416   :  { %v717_v0 = vpop.xlane.xlu1 %716 }
 0x417   :  { %1310 = vrcp.f32 %v717_v0 }
 0x41d   :  { %v1311_v37 = vpop.eup %1310 }
 0x41e   :  { %v720_v13 = vpop.xlane.xlu2 %719  ;;  %v747_v16 = vmul.f32 %v1311_v37, %v1716_v28 }
 0x41f   :  { %1312 = vrcp.f32 %v720_v13 }
 0x425   :  { %v1313_v14 = vpop.eup %1312 }
 0x426   :  { %v748_v18 = vmul.f32 %v1313_v14, %v1720_v3  ;;  %v723_v20 = vpop.xlane.xlu1 %722 }
 0x427   :  { %1314 = vrcp.f32 %v723_v20 }
 0x428   :  { %v755_v19 = vpack.c.bf16 %v748_v18, %v747_v16 }
 0x42a   :  { %1222 = vmatmul.msk.bf16.vlgmr.msrb.gmra.mxu1 %vm117_vm1, %v755_v19 }
 0x42d   :  { %v1315_v8 = vpop.eup %1314 }
 0x42e   :  { %v726_v32 = vpop.xlane.xlu0 %725  ;;  %v749_v12 = vmul.f32 %v1315_v8, %v1724_v41 }
 0x42f   :  { %1316 = vrcp.f32 %v726_v32  ;;  %v1293_v32 = vld [vmem:[%s1813_s2 + $0x43] ss:$0 sm:$0xff] }
 0x435   :  { %v1317_v54 = vpop.eup %1316 }
 0x436   :  { %v750_v57 = vmul.f32 %v1317_v54, %v1728_v24  ;;  %v729_v63 = vpop.xlane.xlu2 %728 }
 0x437   :  { %1318 = vrcp.f32 %v729_v63 }
 0x438   :  { %v756_v59 = vpack.c.bf16 %v750_v57, %v749_v12 }
 0x43a   :  { %1223 = vmatmul.msk.bf16.gmra.mxu1 %vm117_vm1, %v756_v59 }
 0x43d   :  { %v1319_v3 = vpop.eup %1318 }
 0x43e   :  { %v732_v28 = vpop.xlane.xlu1 %731  ;;  %v751_v15 = vmul.f32 %v1319_v3, %v1733_v43  ;;  %v1271_v43 = vld [vmem:[%s1812_s1 + $0x98] sm:$0xff] }
 0x43f   :  { %1320 = vrcp.f32 %v732_v28 }
 0x441   :  { %v816_v46 = vpop.permute.xlu0 %815 }
 0x445   :  { %v1321_v5 = vpop.eup %1320 }
 0x446   :  { %v735_v10 = vpop.xlane.xlu2 %734  ;;  %v752_v17 = vmul.f32 %v1321_v5, %v1305_v60 }
 0x447   :  { %1322 = vrcp.f32 %v735_v10 }
 0x448   :  { %v757_v21 = vpack.c.bf16 %v752_v17, %v751_v15 }
 0x44a   :  { %1224 = vmatmul.msk.bf16.gmra.mxu1 %vm117_vm1, %v757_v21 }
 0x44d   :  { %v1323_v22 = vpop.eup %1322 }
 0x44e   :  { %v738_v41 = vpop.xlane.xlu1 %737  ;;  %v812_v51 = vpop.permute.xlu2 %811  ;;  %v753_v49 = vmul.f32 %v1323_v22, %v1307_v2 }
 0x44f   :  { %1324 = vrcp.f32 %v738_v41  ;;  %836 = vmatpush.bf16.msrb.mxu0 %v812_v51  ;;  %1282 = vmatpush.bf16.msra.mxu2 %v812_v51 }
 0x455   :  { %v1325_v23 = vpop.eup %1324 }
 0x456   :  { %v754_v24 = vmul.f32 %v1325_v23, %v1309_v7 }
 0x458   :  { %v758_v25 = vpack.c.bf16 %v754_v24, %v753_v49 }
 0x45a   :  { %1225 = vmatmul.msk.bf16.gmra.mxu1 %vm117_vm1, %v758_v25 }
 0x466   :  { %v810_v26 = vpop.permute.xlu1 %809 }
 0x467   :  { %837 = vmatpush.bf16.msrb.mxu0 %v810_v26  ;;  %1283 = vmatpush.bf16.msra.mxu2 %v810_v26 }
 0x46b   :  { %899 = vmatpush.bf16.msra.mxu0 %v1271_v43 }
 0x46f   :  { %900 = vmatpush.bf16.msra.mxu0 %v1270_v44 }
 0x4a7   :  { %v785_v27 = vpop.f32.mrf.mxu1 }
 0x4af   :  { %v787_v29 = vpop.f32.mrf.mxu1 }
 0x4b0   :  { %v805_v30 = vpack.c.bf16 %v787_v29, %v785_v27 }
 0x4b2   :  { %1226 = vmatmul.msk.bf16.vlgmr.msrb.gmra.mxu0 %vm449_vm0, %v805_v30 }
 0x4b7   :  { %v790_v31 = vpop.f32.mrf.mxu1 }
 0x4bf   :  { %v792_v33 = vpop.f32.mrf.mxu1 }
 0x4c0   :  { %v806_v34 = vpack.c.bf16 %v792_v33, %v790_v31 }
 0x4c2   :  { %1227 = vmatmul.msk.bf16.vlgmr.msra.gmra.mxu2 %vm449_vm0, %v806_v34 }
 0x4c7   :  { %v795_v35 = vpop.f32.mrf.mxu1 }
 0x4cf   :  { %v797_v36 = vpop.f32.mrf.mxu1 }
 0x4d0   :  { %v807_v38 = vpack.c.bf16 %v797_v36, %v795_v35 }
 0x4d2   :  { %1228 = vmatmul.msk.bf16.gmra.mxu2 %vm449_vm0, %v807_v38 }
 0x4d7   :  { %v800_v39 = vpop.f32.mrf.mxu1 }
 0x4df   :  { %v802_v40 = vpop.f32.mrf.mxu1 }
 0x4e0   :  { %v808_v42 = vpack.c.bf16 %v802_v40, %v800_v39 }
 0x4e2   :  { %1229 = vmatmul.msk.bf16.gmra.mxu2 %vm449_vm0, %v808_v42 }
 0x52f   :  { %v839_v45 = vpop.f32.mrf.mxu0 }
 0x530   :  { %v840_v48 = vadd.f32 %v839_v45, %v816_v46 }
 0x537   :  { %v841_v47 = vpop.f32.mrf.mxu0 }
 0x538   :  { %v842_v50 = vadd.f32 %v841_v47, %v816_v46 }
 0x53a   :  { %v859_v53 = vpack.c.bf16 %v842_v50, %v840_v48 }
 0x53c   :  { %1238 = vmatmul.msk.bf16.vlgmr.msra.gmra.mxu0 %vm449_vm0, %v859_v53 }
 0x545   :  { %v844_v52 = vpop.f32.mrf.mxu2 }
 0x546   :  { %v845_v56 = vadd.f32 %v844_v52, %v816_v46 }
 0x54d   :  { %v846_v55 = vpop.f32.mrf.mxu2 }
 0x54e   :  { %v847_v60 = vadd.f32 %v846_v55, %v816_v46 }
 0x550   :  { %v860_v61 = vpack.c.bf16 %v847_v60, %v845_v56 }
 0x552   :  { %1239 = vmatmul.msk.bf16.gmra.mxu0 %vm449_vm0, %v860_v61 }
 0x555   :  { %v849_v62 = vpop.f32.mrf.mxu2 }
 0x556   :  { %v850_v9 = vadd.f32 %v849_v62, %v816_v46 }
 0x55d   :  { %v851_v1 = vpop.f32.mrf.mxu2 }
 0x55e   :  { %v852_v6 = vadd.f32 %v851_v1, %v816_v46 }
 0x560   :  { %v861_v2 = vpack.c.bf16 %v852_v6, %v850_v9 }
 0x562   :  { %1240 = vmatmul.msk.bf16.gmra.mxu0 %vm449_vm0, %v861_v2 }
 0x565   :  { %v854_v4 = vpop.f32.mrf.mxu2 }
 0x566   :  { %v855_v7 = vadd.f32 %v854_v4, %v816_v46 }
 0x56d   :  { %v856_v58 = vpop.f32.mrf.mxu2 }
 0x56e   :  { %v857_v11 = vadd.f32 %v856_v58, %v816_v46 }
 0x570   :  { %v862_v0 = vpack.c.bf16 %v857_v11, %v855_v7 }
 0x572   :  { %1241 = vmatmul.msk.bf16.gmra.mxu0 %vm449_vm0, %v862_v0 }
 0x5b9   :  { %v902_v13 = vpop.f32.mrf.mxu0 }
 0x5ba   :  { %v903_v59 = vadd.f32 %v1293_v32, %v902_v13 }
 0x5bc   :  { %v923_v51 = vsel %vm922_vm3, %v903_v59, -inf }
 0x5c1   :  { %v904_v37 = vpop.f32.mrf.mxu0 }
 0x5c2   :  { %v905_v54 = vadd.f32 %v1293_v32, %v904_v37 }
 0x5c4   :  { %v924_v10 = vsel %vm922_vm3, %v905_v54, -inf }
 0x5cf   :  { %v907_v14 = vpop.f32.mrf.mxu0 }
 0x5d0   :  { %v908_v63 = vadd.f32 %v1293_v32, %v907_v14 }
 0x5d2   :  { %v925_v22 = vsel %vm922_vm3, %v908_v63, -inf }
 0x5d7   :  { %v909_v16 = vpop.f32.mrf.mxu0 }
 0x5d8   :  { %v910_v28 = vadd.f32 %v1293_v32, %v909_v16 }
 0x5da   :  { %v926_v23 = vsel %vm922_vm3, %v910_v28, -inf }
 0x5df   :  { %v912_v18 = vpop.f32.mrf.mxu0 }
 0x5e0   :  { %v913_v12 = vadd.f32 %v1293_v32, %v912_v18 }
 0x5e2   :  { %v927_v15 = vsel %vm922_vm3, %v913_v12, -inf }
 0x5e3   :  { %v928_v24 = vmax.f32 %v923_v51, %v927_v15 }
 0x5e7   :  { %v914_v19 = vpop.f32.mrf.mxu0 }
 0x5e8   :  { %v915_v8 = vadd.f32 %v1293_v32, %v914_v19 }
 0x5ea   :  { %v929_v3 = vsel %vm922_vm3, %v915_v8, -inf }
 0x5eb   :  { %v930_v41 = vmax.f32 %v924_v10, %v929_v3 }
 0x5ed   :  { %v935_v27 = vmax.f32 %v928_v24, %v930_v41 }
 0x5ef   :  { %v917_v20 = vpop.f32.mrf.mxu0 }
 0x5f0   :  { %v918_v57 = vadd.f32 %v1293_v32, %v917_v20 }
 0x5f2   :  { %v931_v17 = vsel %vm922_vm3, %v918_v57, -inf }
 0x5f3   :  { %v932_v25 = vmax.f32 %v925_v22, %v931_v17 }
 0x5f7   :  { %v919_v5 = vpop.f32.mrf.mxu0 }
 0x5f8   :  { %v920_v21 = vadd.f32 %v1293_v32, %v919_v5 }
 0x5fa   :  { %v933_v49 = vsel %vm922_vm3, %v920_v21, -inf }
 0x5fb   :  { %v934_v26 = vmax.f32 %v926_v23, %v933_v49 }
 0x5fd   :  { %v936_v29 = vmax.f32 %v932_v25, %v934_v26 }
 0x5ff   :  { %v937_v30 = vmax.f32 %v935_v27, %v936_v29 }
 0x601   :  { %v938_v31 = vrot.slane %v937_v30, 4 }
 0x603   :  { %v939_v33 = vmax.f32 %v937_v30, %v938_v31 }
 0x605   :  { %v940_v34 = vrot.slane %v939_v33, 2 }
 0x607   :  { %v941_v35 = vmax.f32 %v939_v33, %v940_v34 }
 0x609   :  { %v942_v36 = vrot.slane %v941_v35, 1 }
 0x60b   :  { %v943_v38 = vmax.f32 %v941_v35, %v942_v36 }
 0x60d   :  { %v944_v39 = vsub.f32 %v903_v59, %v943_v38  ;;  %v945_v40 = vsub.f32 %v905_v54, %v943_v38  ;;  %v946_v42 = vsub.f32 %v908_v63, %v943_v38  ;;  %v947_v43 = vsub.f32 %v910_v28, %v943_v38 }
 0x60e   :  { %v948_v44 = vsub.f32 %v913_v12, %v943_v38  ;;  %v949_v48 = vsub.f32 %v915_v8, %v943_v38  ;;  %v950_v53 = vsub.f32 %v918_v57, %v943_v38  ;;  %v951_v55 = vsub.f32 %v920_v21, %v943_v38  ;;  %v1011_v38 = vld [vmem:[%s1813_s2 + $0x44] sm:$0x1] }
 0x60f   :  { %v952_v45 = vmul.f32 1.442695, %v944_v39  ;;  %v954_v46 = vmul.f32 1.442695, %v945_v40  ;;  %v956_v47 = vmul.f32 1.442695, %v946_v42  ;;  %v1060_v40 = vlaneseq }
 0x610   :  { %v958_v50 = vmul.f32 1.442695, %v947_v43  ;;  %v960_v52 = vmul.f32 1.442695, %v948_v44  ;;  %v962_v56 = vmul.f32 1.442695, %v949_v48 }
 0x611   :  { %1326 = vpow2.f32 %v952_v45  ;;  %v964_v60 = vmul.f32 1.442695, %v950_v53  ;;  %v966_v1 = vmul.f32 1.442695, %v951_v55  ;;  %v1012_v39 = vld [vmem:[%s1813_s2 + $0x45] sm:$0x1] }
 0x612   :  { %1328 = vpow2.f32 %v954_v46  ;;  %v1061_v42 = vand.u32 127, %v1060_v40  ;;  %v1374_v45 = vmov 1.0   ;;  %s1375_s2 = smov [#allocation2]  }
 0x613   :  { %1330 = vpow2.f32 %v956_v47  ;;  %s1093_s29 = sshll.u32 %s1375_s2, 4  ;;  %s1094_s29 = int_to_ptr.vmem [resolvable:$true] %s1093_s29 }
 0x614   :  { %1332 = vpow2.f32 %v958_v50  ;;  %vm1062_vm10 = vcmp.eq.s32.totalorder %v1061_v42, 0  ;;  %vm1082_vm11 = vcmp.eq.s32.totalorder %v1061_v42, 2  ;;  %vm1081_vm12 = vcmp.eq.s32.totalorder %v1061_v42, 1 }
 0x615   :  { %1334 = vpow2.f32 %v960_v52  ;;  %v1063_v46 = vsel %vm1062_vm10, -1.0, %v1374_v45 }
 0x616   :  { %1336 = vpow2.f32 %v962_v56 }
 0x617   :  { %v1784_v61 = vpop.eup %1326  ;;  %1338 = vpow2.f32 %v964_v60 }
 0x618   :  { %v1786_v62 = vpop.eup %1328  ;;  %v968_v9 = vsel %vm922_vm3, %v1784_v61, 0.0  ;;  %1340 = vpow2.f32 %v966_v1 }
 0x619   :  { %v1331_v6 = vpop.eup %1330  ;;  %v969_v2 = vsel %vm922_vm3, %v1786_v62, 0.0 }
 0x61a   :  { %v1333_v4 = vpop.eup %1332  ;;  %v970_v58 = vadd.f32 %v969_v2, %v968_v9  ;;  %v971_v7 = vsel %vm922_vm3, %v1331_v6, 0.0 }
 0x61b   :  { %v1335_v11 = vpop.eup %1334  ;;  %v973_v13 = vsel %vm922_vm3, %v1333_v4, 0.0 }
 0x61c   :  { %v972_v0 = vadd.f32 %v971_v7, %v970_v58  ;;  %v1337_v37 = vpop.eup %1336  ;;  %v975_v16 = vsel %vm922_vm3, %v1335_v11, 0.0 }
 0x61d   :  { %v1339_v18 = vpop.eup %1338  ;;  %v977_v20 = vsel %vm922_vm3, %v1337_v37, 0.0 }
 0x61e   :  { %v974_v14 = vadd.f32 %v973_v13, %v972_v0  ;;  %v1341_v32 = vpop.eup %1340  ;;  %v979_v54 = vsel %vm922_vm3, %v1339_v18, 0.0 }
 0x61f   :  { %v981_v57 = vsel %vm922_vm3, %v1341_v32, 0.0 }
 0x620   :  { %v976_v19 = vadd.f32 %v975_v16, %v974_v14 }
 0x622   :  { %v978_v8 = vadd.f32 %v977_v20, %v976_v19 }
 0x624   :  { %v980_v12 = vadd.f32 %v979_v54, %v978_v8 }
 0x626   :  { %v982_v59 = vadd.f32 %v981_v57, %v980_v12 }
 0x628   :  { %v983_v63 = vrot.slane %v982_v59, 4 }
 0x62a   :  { %v984_v28 = vadd.f32 %v983_v63, %v982_v59 }
 0x62c   :  { %v985_v3 = vrot.slane %v984_v28, 2 }
 0x62e   :  { %v986_v5 = vadd.f32 %v985_v3, %v984_v28 }
 0x630   :  { %v987_v10 = vrot.slane %v986_v5, 1 }
 0x632   :  { %v988_v15 = vadd.f32 %v987_v10, %v986_v5 }
 0x634   :  { %1342 = vrcp.f32 %v988_v15  ;;  %v1000_v51 = vand.u32 2147483648, %v988_v15  ;;  %v998_v23 = vand.u32 2147483647, %v988_v15  ;;  %vm994_vm5 = vweird.f32 %v988_v15 }
 0x636   :  { %v1001_v24 = vor.u32 1.1754944e-38, %v1000_v51  ;;  %vm999_vm7 = vcmp.eq.f32.partialorder %v998_v23, 8.507059e+37 }
 0x63a   :  { %v1343_v17 = vpop.eup %1342 }
 0x63b   :  { %v990_v21 = vmul.f32 %v1343_v17, %v988_v15  ;;  %vm995_vm4 = vweird.f32 %v1343_v17 }
 0x63c   :  { %vm996_vm6 = vmor %vm994_vm5, %vm995_vm4 }
 0x63d   :  { %v991_v41 = vsub.f32 1.0, %v990_v21 }
 0x63f   :  { %v992_v22 = vmul.f32 %v1343_v17, %v991_v41 }
 0x641   :  { %v993_v49 = vadd.f32 %v1343_v17, %v992_v22 }
 0x643   :  { %v997_v25 = vsel %vm996_vm6, %v1343_v17, %v993_v49 }
 0x644   :  { %v1002_v26 = vsel %vm999_vm7, %v1001_v24, %v997_v25 }
 0x645   :  { %v1010_v27 = vmul.f32 %v1341_v32, %v1002_v26  ;;  %v1009_v29 = vmul.f32 %v1339_v18, %v1002_v26  ;;  %v1008_v30 = vmul.f32 %v1337_v37, %v1002_v26  ;;  %v1007_v31 = vmul.f32 %v1335_v11, %v1002_v26 }
 0x646   :  { %v1006_v33 = vmul.f32 %v1333_v4, %v1002_v26  ;;  %v1005_v34 = vmul.f32 %v1331_v6, %v1002_v26  ;;  %v1004_v35 = vmul.f32 %v1786_v62, %v1002_v26  ;;  %v1003_v36 = vmul.f32 %v1784_v61, %v1002_v26 }
 0x647   :  { %1025 = vmatpush.msra.mxu3 %v1010_v27  ;;  %1048 = vmatpush.msra.mxu1 %v1010_v27 }
 0x649   :  { %1026 = vmatpush.msra.mxu3 %v1009_v29  ;;  %1049 = vmatpush.msra.mxu1 %v1009_v29 }
 0x64b   :  { %1027 = vmatpush.msra.mxu3 %v1008_v30  ;;  %1050 = vmatpush.msra.mxu1 %v1008_v30 }
 0x64d   :  { %1028 = vmatpush.msra.mxu3 %v1007_v31  ;;  %1051 = vmatpush.msra.mxu1 %v1007_v31 }
 0x64f   :  { %1029 = vmatpush.msra.mxu3 %v1006_v33  ;;  %1052 = vmatpush.msra.mxu1 %v1006_v33 }
 0x651   :  { %1030 = vmatpush.msra.mxu3 %v1005_v34  ;;  %1053 = vmatpush.msra.mxu1 %v1005_v34 }
 0x653   :  { %1031 = vmatpush.msra.mxu3 %v1004_v35  ;;  %1054 = vmatpush.msra.mxu1 %v1004_v35 }
 0x655   :  { %1032 = vmatpush.msra.mxu3 %v1003_v36  ;;  %1055 = vmatpush.msra.mxu1 %v1003_v36 }
 0x656   :  { %1242 = vmatmul.msk.f32.vlgmr.msra.gmra.mxu3 %vm1013_vm8, %v1011_v38  ;;  %1243 = vmatmul.msk.f32.vlgmr.msra.gmra.mxu1 %vm1013_vm8, %v1012_v39 }
 0x6d3   :  { %v1057_v43 = vpop.f32.mrf.mxu1 }
 0x6d4   :  { %v1069_v44 = vsel %vm1064_vm9, %v1057_v43, 0.0  ;;  %v1077_v47 = vmul.f32 %v1063_v46, %v1057_v43 }
 0x6d5   :  { %1070 = vadd.xlane.f32.xlu2 %v1069_v44 }
 0x6d6   :  { %v1078_v52 = vsel %vm1064_vm9, %v1077_v47, 0.0 }
 0x6d9   :  { %v1034_v48 = vpop.f32.mrf.mxu3 }
 0x6da   :  { %v1073_v50 = vmul.f32 %v1063_v46, %v1034_v48  ;;  %v1065_v53 = vsel %vm1064_vm9, %v1034_v48, 0.0 }
 0x6db   :  { %1066 = vadd.xlane.f32.xlu1 %v1065_v53 }
 0x6dc   :  { %v1074_v55 = vsel %vm1064_vm9, %v1073_v50, 0.0 }
 0x6dd   :  { %1079 = vadd.xlane.f32.xlu2 %v1078_v52  ;;  %1075 = vadd.xlane.f32.xlu0 %v1074_v55 }
 0x748   :  { %v1071_v56 = vpop.xlane.xlu2 %1070 }
 0x749   :  { %v1072_v61 = vmul.f32 0.5, %v1071_v56 }
 0x74e   :  { %v1067_v60 = vpop.xlane.xlu1 %1066 }
 0x74f   :  { %v1068_v6 = vmul.f32 0.5, %v1067_v60 }
 0x750   :  { %v1080_v62 = vpop.xlane.xlu2 %1079  ;;  %v1076_v1 = vpop.xlane.xlu0 %1075 }
 0x751   :  { %v1083_v9 = vsel %vm1082_vm11, %v1076_v1, %v1080_v62 }
 0x752   :  { %v1084_v2 = vsel %vm1081_vm12, %v1072_v61, %v1083_v9 }
 0x753   :  { %v1085_v4 = vsel %vm1062_vm10, %v1068_v6, %v1084_v2 }
 0x754   :  { %1087 = vst.msk [vmem:[#allocation2] sm:$0x1] %vm1086_vm13, %v1085_v4 }
 0x755   :  { %1098 = dma.vmem_to_hbm [thread:$0]  %s1094_s29, 16, %s1096_s5, [#allocation3]  }
 0x756   :  { %1368 = dma.done.wait [#allocation3], 16  }
 0x757   :  { %1369 = vsyncadd [#allocation3], 4294967280 }
 0x758   :  { %1103 = vsyncpa [#allocation3], 1 }

</bundles_post_ra>
